<compile_context>
chip_gen: v7x
topology: tpu7x:2x2x1
jax: 0.10.0
libtpu: 0.0.40
codegen_flags: <defaults>
</compile_context>

<pallas_src>
import functools
import math

import jax
import jax.numpy as jnp
from jax.experimental import pallas as pl
from jax.experimental.pallas import tpu as pltpu


def _round_up(x, m):
    return ((x + m - 1) // m) * m


# ---------------------------------------------------------------------------
# Kernel 1: fused linear  y = act(x @ W + b)
# ---------------------------------------------------------------------------
def _linear_kernel(x_ref, w_ref, b_ref, o_ref, *, act):
    acc = jnp.dot(x_ref[...], w_ref[...], preferred_element_type=jnp.float32)
    acc = acc + b_ref[...]
    if act == "gelu":
        acc = jax.nn.gelu(acc)          # tanh-approx GELU (EUP/VPU friendly)
    elif act == "relu":
        acc = jnp.maximum(acc, 0.0)
    o_ref[...] = acc.astype(o_ref.dtype)


def linear(x, w, b, act=None, block_m=256):
    """x: (M, K), w: (K, N), b: (N,).  Lane-dense padding to (8, 128) multiples."""
    M, K = x.shape
    Kw, N = w.shape
    assert K == Kw
    Mp0 = _round_up(max(M, 1), 8)
    bm = min(Mp0, block_m)
    Mp = _round_up(Mp0, bm)
    Kp = _round_up(K, 128)
    Np = _round_up(N, 128)
    x_p = jnp.pad(x, ((0, Mp - M), (0, Kp - K)))
    w_p = jnp.pad(w, ((0, Kp - K), (0, Np - N)))
    b_p = jnp.pad(b.reshape(1, N), ((0, 0), (0, Np - N)))

    out = pl.pallas_call(
        functools.partial(_linear_kernel, act=act),
        out_shape=jax.ShapeDtypeStruct((Mp, Np), x.dtype),
        grid_spec=pltpu.PrefetchScalarGridSpec(
            num_scalar_prefetch=0,
            grid=(Mp // bm,),
            in_specs=[
                pl.BlockSpec((bm, Kp), lambda i: (i, 0)),
                pl.BlockSpec((Kp, Np), lambda i: (0, 0)),
                pl.BlockSpec((1, Np), lambda i: (0, 0)),
            ],
            out_specs=pl.BlockSpec((bm, Np), lambda i: (i, 0)),
        ),
        compiler_params=pltpu.CompilerParams(dimension_semantics=("parallel",)),
    )(x_p, w_p, b_p)
    return out[:M, :N]


# ---------------------------------------------------------------------------
# Kernel 2: attention core for Attention(score_function='dot_product', n_head=1)
#   score = bmm(qx, kx^T); softmax over dim 0 (as in the reference); out = bmm(score, kx)
# ---------------------------------------------------------------------------
def _attn_core_kernel(qx_ref, kx_ref, o_ref):
    qx = qx_ref[...].astype(jnp.float32)                                   # (Nb, Lq, H)
    kx = kx_ref[...].astype(jnp.float32)                                   # (Nb, Lk, H)
    score = jnp.sum(qx[:, :, None, :] * kx[:, None, :, :], axis=-1)        # (Nb, Lq, Lk)
    m = jnp.max(score, axis=0, keepdims=True)                              # softmax over dim 0
    e = jnp.exp(score - m)
    p = e / jnp.sum(e, axis=0, keepdims=True)
    out = jnp.sum(p[:, :, :, None] * kx[:, None, :, :], axis=2)            # (Nb, Lq, H)
    o_ref[...] = out.astype(o_ref.dtype)


def _attn_core(qx, kx):
    Nb, Lq, H = qx.shape
    return pl.pallas_call(
        _attn_core_kernel,
        out_shape=jax.ShapeDtypeStruct((Nb, Lq, H), qx.dtype),
        in_specs=[pl.BlockSpec(memory_space=pltpu.MemorySpace.VMEM)] * 2,
        out_specs=pl.BlockSpec(memory_space=pltpu.MemorySpace.VMEM),
    )(qx, kx)


def attention_forward(p, k, q):
    """Attention module (dot_product, n_head=1); dropout = identity."""
    if q.ndim == 2:
        q = q[:, None, :]
    if k.ndim == 2:
        k = k[:, None, :]
    Nb, Lk, _ = k.shape
    Lq = q.shape[1]
    H = p["w_k"][0].shape[1]
    kx = linear(k.reshape(Nb * Lk, -1), *p["w_k"]).reshape(Nb, Lk, H)
    qx = linear(q.reshape(Nb * Lq, -1), *p["w_q"]).reshape(Nb, Lq, H)
    out = _attn_core(qx, kx)
    out = linear(out.reshape(Nb * Lq, H), *p["proj"]).reshape(Nb, Lq, -1)
    return out


# ---------------------------------------------------------------------------
# Kernel 3: LayerNorm over the last dim
# ---------------------------------------------------------------------------
def _layernorm_kernel(x_ref, g_ref, b_ref, o_ref):
    x = x_ref[...].astype(jnp.float32)
    mean = jnp.mean(x, axis=-1, keepdims=True)
    cen = x - mean
    var = jnp.mean(cen * cen, axis=-1, keepdims=True)
    inv = jax.lax.rsqrt(var + 1e-5)
    o_ref[...] = (cen * inv * g_ref[...] + b_ref[...]).astype(o_ref.dtype)


def layer_norm(x, gamma, beta):
    shape = x.shape
    D = shape[-1]
    x2 = x.reshape(-1, D)
    out = pl.pallas_call(
        _layernorm_kernel,
        out_shape=jax.ShapeDtypeStruct(x2.shape, x2.dtype),
        in_specs=[pl.BlockSpec(memory_space=pltpu.MemorySpace.VMEM)] * 3,
        out_specs=pl.BlockSpec(memory_space=pltpu.MemorySpace.VMEM),
    )(x2, gamma.reshape(1, D), beta.reshape(1, D))
    return out.reshape(shape)


# ---------------------------------------------------------------------------
# Kernel 4: one LSTM direction; time steps on the grid, h/c in VMEM scratch
# ---------------------------------------------------------------------------
def _lstm_dir_kernel(x_ref, wih_ref, whh_ref, b_ref, y_ref, h_sc, c_sc):
    t = pl.program_id(0)

    @pl.when(t == 0)
    def _():
        h_sc[...] = jnp.zeros_like(h_sc)
        c_sc[...] = jnp.zeros_like(c_sc)

    H = h_sc.shape[-1]
    x_t = x_ref[0].astype(jnp.float32)                                      # (B, Din)
    gates = (jnp.dot(x_t, wih_ref[...], preferred_element_type=jnp.float32)
             + jnp.dot(h_sc[...], whh_ref[...], preferred_element_type=jnp.float32)
             + b_ref[...])                                                  # (B, 4H)
    i_g = jax.nn.sigmoid(gates[:, 0 * H:1 * H])
    f_g = jax.nn.sigmoid(gates[:, 1 * H:2 * H])
    g_g = jnp.tanh(gates[:, 2 * H:3 * H])
    o_g = jax.nn.sigmoid(gates[:, 3 * H:4 * H])
    c_new = f_g * c_sc[...] + i_g * g_g
    h_new = o_g * jnp.tanh(c_new)
    c_sc[...] = c_new
    h_sc[...] = h_new
    y_ref[0] = h_new.astype(y_ref.dtype)


def lstm_direction(x, w_ih, w_hh, b_ih, b_hh):
    T, B, Din = x.shape
    H = w_hh.shape[1]
    wih_t = jnp.transpose(w_ih)                 # (Din, 4H)
    whh_t = jnp.transpose(w_hh)                 # (H, 4H)
    b = (b_ih + b_hh).reshape(1, 4 * H)
    return pl.pallas_call(
        _lstm_dir_kernel,
        out_shape=jax.ShapeDtypeStruct((T, B, H), x.dtype),
        grid_spec=pltpu.PrefetchScalarGridSpec(
            num_scalar_prefetch=0,
            grid=(T,),
            in_specs=[
                pl.BlockSpec((1, B, Din), lambda t: (t, 0, 0)),
                pl.BlockSpec((Din, 4 * H), lambda t: (0, 0)),
                pl.BlockSpec((H, 4 * H), lambda t: (0, 0)),
                pl.BlockSpec((1, 4 * H), lambda t: (0, 0)),
            ],
            out_specs=pl.BlockSpec((1, B, H), lambda t: (t, 0, 0)),
            scratch_shapes=[
                pltpu.VMEM((B, H), jnp.float32),    # h carry
                pltpu.VMEM((B, H), jnp.float32),    # c carry
            ],
        ),
        compiler_params=pltpu.CompilerParams(dimension_semantics=("arbitrary",)),
    )(x, wih_t, whh_t, b)


def lstm_bidir_layer(x, fwd, bwd):
    out_f = lstm_direction(x, *fwd)
    out_b = lstm_direction(x[::-1], *bwd)[::-1]
    return jnp.concatenate([out_f, out_b], axis=-1)


# ---------------------------------------------------------------------------
# Kernel 5: batched GRUCell with per-sample (per-speaker) weights
# ---------------------------------------------------------------------------
def _gru_cell_kernel(x_ref, h_ref, wih_ref, whh_ref, bih_ref, bhh_ref, o_ref):
    x = x_ref[...].astype(jnp.float32)                                      # (B, Din)
    h = h_ref[...].astype(jnp.float32)                                      # (B, Dh)
    gi = jnp.sum(x[:, None, :] * wih_ref[...], axis=-1) + bih_ref[...]      # (B, 3Dh)
    gh = jnp.sum(h[:, None, :] * whh_ref[...], axis=-1) + bhh_ref[...]      # (B, 3Dh)
    Dh = h_ref.shape[-1]
    r = jax.nn.sigmoid(gi[:, 0:Dh] + gh[:, 0:Dh])
    z = jax.nn.sigmoid(gi[:, Dh:2 * Dh] + gh[:, Dh:2 * Dh])
    n = jnp.tanh(gi[:, 2 * Dh:3 * Dh] + r * gh[:, 2 * Dh:3 * Dh])
    o_ref[...] = ((1.0 - z) * n + z * h).astype(o_ref.dtype)


def gru_cell_per_speaker(x, h, w_ih, w_hh, b_ih, b_hh):
    B, Dh = h.shape
    return pl.pallas_call(
        _gru_cell_kernel,
        out_shape=jax.ShapeDtypeStruct((B, Dh), h.dtype),
        in_specs=[pl.BlockSpec(memory_space=pltpu.MemorySpace.VMEM)] * 6,
        out_specs=pl.BlockSpec(memory_space=pltpu.MemorySpace.VMEM),
    )(x, h, w_ih, w_hh, b_ih, b_hh)


# ---------------------------------------------------------------------------
# Kernel 6: log-softmax over the last dim
# ---------------------------------------------------------------------------
def _log_softmax_kernel(x_ref, o_ref):
    x = x_ref[...].astype(jnp.float32)
    m = jnp.max(x, axis=-1, keepdims=True)
    s = x - m
    lse = jnp.log(jnp.sum(jnp.exp(s), axis=-1, keepdims=True))
    o_ref[...] = (s - lse).astype(o_ref.dtype)


def log_softmax(x):
    return pl.pallas_call(
        _log_softmax_kernel,
        out_shape=jax.ShapeDtypeStruct(x.shape, x.dtype),
        in_specs=[pl.BlockSpec(memory_space=pltpu.MemorySpace.VMEM)],
        out_specs=pl.BlockSpec(memory_space=pltpu.MemorySpace.VMEM),
    )(x)


# ---------------------------------------------------------------------------
# Module-level wrappers (mirror the PyTorch modules)
# ---------------------------------------------------------------------------
def fully_connection_forward(p, x):
    sh = x.shape[:-1]
    y = x.reshape(-1, x.shape[-1])
    y = linear(y, *p["fc1"], act="gelu")
    y = linear(y, *p["fc2"], act="gelu")
    y = linear(y, *p["fc3"], act="gelu")
    y = linear(y, *p["fc4"], act="gelu")
    y = linear(y, *p["fc5"])
    return y.reshape(*sh, y.shape[-1])


def emoformer_forward(p, r1, r2, r3, r4):
    """Emoformer_t(1024), mode1=0, norm_strategy=0; dropouts are identity."""
    T, B, F = r1.shape
    r = (r1 + r2 + r3 + r4) * 0.25
    r = linear(r.reshape(T * B, F), *p["l1"]).reshape(T, B, -1)     # (T, B, 512)
    r_u = r
    out_t1 = attention_forward(p["att1"], r, r)
    r_1 = layer_norm(r + out_t1, *p["norm_1"])
    out_t2 = attention_forward(p["att2"], r_1, r_1)
    r_n = layer_norm(r + out_t2, *p["norm_2"])
    r_out = fully_connection_forward(p["fc1"], r_n + r_u)           # (T, B, 100)
    r_u_out = linear(r_u.reshape(T * B, -1), *p["l2"]).reshape(T, B, -1)   # (T, B, 500)
    return r_u_out, r_out


def commonsense_cell_forward(p, u, sk, nu, lk, a, s0, qmask, qmask_n):
    B, P, Dr = s0.shape
    batch_idx = jnp.arange(B)
    qm_idx = jnp.argmax(qmask, axis=1)
    qm_n_idx = jnp.argmax(qmask_n, axis=1)
    s0_s_sel = s0[batch_idx, qm_idx]                                # (B, Dr)
    s0_l_sel = s0[batch_idx, qm_n_idx]

    s_0 = attention_forward(p["state11"], sk, u)[:, 0, :]
    s_s = attention_forward(p["state12"], sk, s_0)[:, 0, :]
    s_1 = attention_forward(p["state21"], lk, nu)[:, 0, :]
    s_l = attention_forward(p["state22"], lk, s_1)[:, 0, :]

    # TODO(synk): PyTorch lazily creates one GRUCell per seen speaker id; here all
    # N_s cells are pre-created and gathered by speaker / listener index.
    def gather(idx):
        return (p["gru_w_ih"][idx], p["gru_w_hh"][idx],
                p["gru_b_ih"][idx], p["gru_b_hh"][idx])

    s_new = gru_cell_per_speaker(s_s, s0_s_sel, *gather(qm_idx))    # (B, Dr)
    l_new = gru_cell_per_speaker(s_l, s0_l_sel, *gather(qm_n_idx))  # (B, Dr)

    onehot_s = (jnp.arange(P)[None, :] == qm_idx[:, None]).astype(s0.dtype)
    onehot_l = (jnp.arange(P)[None, :] == qm_n_idx[:, None]).astype(s0.dtype)
    s_full = onehot_s[:, :, None] * s_new[:, None, :]
    l_full = onehot_l[:, :, None] * l_new[:, None, :]
    qm_ = qmask[:, :, None]
    qm_n_ = qmask_n[:, :, None]
    return s0 * (1.0 - qm_ - qm_n_) + s_full * qm_ + l_full * qm_n_


def commonsense_rnn_forward(p, UU, SK, NU, LK, A, qmask, D_r):
    T, B, _ = UU.shape
    P = qmask.shape[2]
    s0 = jnp.zeros((B, P, D_r), UU.dtype)
    batch_idx = jnp.arange(B)
    outs = []
    for t in range(T):
        qm = qmask[t]
        qm_n = qmask[t + 1] if t < T - 1 else qmask[t]
        s0 = commonsense_cell_forward(p, UU[t], SK[t], NU[t], LK[t], A[t],
                                      s0, qm, qm_n)
        qm_idx = jnp.argmax(qm, axis=1)
        outs.append(s0[batch_idx, qm_idx])
    return jnp.stack(outs, axis=0)          # == s_[1:, :, :] in the reference


def lstm_model_forward(params, r1, r2, r3, r4, a, qmask, umask, UU, SK, NU, LK):
    # Emoformer_t branch (its outputs are not consumed downstream in the reference
    # forward; executed here for structural fidelity).
    _r_u, _r = emoformer_forward(params["emo"], r1, r2, r3, r4)

    # CommonsenseRNN branch.
    D_r = params["common"]["gru_w_hh"].shape[-1]
    s = commonsense_rnn_forward(params["common"], UU, SK, NU, LK, a, qmask, D_r)

    # TODO(synk): `U` is undefined in the reference forward; interpreted as UU.
    U = UU.astype(jnp.float32)
    lstm_in = jnp.concatenate([U, s], axis=-1)                       # (T, B, D_u + D_r)

    h = lstm_bidir_layer(lstm_in, params["lstm"]["l0_f"], params["lstm"]["l0_b"])
    emotions = lstm_bidir_layer(h, params["lstm"]["l1_f"], params["lstm"]["l1_b"])

    T, B, E2 = emotions.shape
    hidden = linear(emotions.reshape(T * B, E2), *params["linear"], act="relu")
    logits = linear(hidden, *params["smax_fc"])
    n_classes = logits.shape[-1]
    log_prob = log_softmax(logits).reshape(T, B, n_classes)

    alpha, alpha_f, alpha_b = [], [], []          # attention=False path
    return log_prob, alpha, alpha_f, alpha_b


# ---------------------------------------------------------------------------
# Parameter initialization (deterministic, PyTorch-style uniform ranges)
# ---------------------------------------------------------------------------
def _linear_init(key, din, dout):
    kw, kb = jax.random.split(key)
    bound = 1.0 / math.sqrt(din)
    w = jax.random.uniform(kw, (din, dout), jnp.float32, -bound, bound)
    b = jax.random.uniform(kb, (dout,), jnp.float32, -bound, bound)
    return (w, b)


def _attention_init(key, embed_dim):
    k1, k2, k3 = jax.random.split(key, 3)
    return {"w_k": _linear_init(k1, embed_dim, embed_dim),
            "w_q": _linear_init(k2, embed_dim, embed_dim),
            "proj": _linear_init(k3, embed_dim, embed_dim)}


def _layernorm_init(dim):
    return (jnp.ones((dim,), jnp.float32), jnp.zeros((dim,), jnp.float32))


def _fc_init(key):
    ks = jax.random.split(key, 5)
    return {"fc1": _linear_init(ks[0], 512, 512),
            "fc2": _linear_init(ks[1], 512, 256),
            "fc3": _linear_init(ks[2], 256, 128),
            "fc4": _linear_init(ks[3], 128, 128),
            "fc5": _linear_init(ks[4], 128, 100)}


def init_params(key, *, D_u, D_k, D_r, D_e, D_h, N_s, n_classes, emo_dim=1024):
    keys = jax.random.split(key, 16)
    emo = {
        "l1": _linear_init(keys[0], emo_dim, 512),
        "att1": _attention_init(keys[1], 512),
        "att2": _attention_init(keys[2], 512),
        "norm_1": _layernorm_init(512),
        "norm_2": _layernorm_init(512),
        "fc1": _fc_init(keys[3]),
        "l2": _linear_init(keys[4], 512, 500),
    }
    kg = jax.random.split(keys[5], 4)
    gbound = 1.0 / math.sqrt(D_r)
    common = {
        "state11": _attention_init(keys[6], D_k),
        "state12": _attention_init(keys[7], D_k),
        "state21": _attention_init(keys[8], D_k),
        "state22": _attention_init(keys[9], D_k),
        "gru_w_ih": jax.random.uniform(kg[0], (N_s, 3 * D_r, D_k), jnp.float32, -gbound, gbound),
        "gru_w_hh": jax.random.uniform(kg[1], (N_s, 3 * D_r, D_r), jnp.float32, -gbound, gbound),
        "gru_b_ih": jax.random.uniform(kg[2], (N_s, 3 * D_r), jnp.float32, -gbound, gbound),
        "gru_b_hh": jax.random.uniform(kg[3], (N_s, 3 * D_r), jnp.float32, -gbound, gbound),
    }

    def lstm_dir_init(k, din, hid):
        k1, k2, k3, k4 = jax.random.split(k, 4)
        bnd = 1.0 / math.sqrt(hid)
        return (jax.random.uniform(k1, (4 * hid, din), jnp.float32, -bnd, bnd),
                jax.random.uniform(k2, (4 * hid, hid), jnp.float32, -bnd, bnd),
                jax.random.uniform(k3, (4 * hid,), jnp.float32, -bnd, bnd),
                jax.random.uniform(k4, (4 * hid,), jnp.float32, -bnd, bnd))

    kl = jax.random.split(keys[10], 4)
    lstm = {
        "l0_f": lstm_dir_init(kl[0], D_u + D_r, D_e),
        "l0_b": lstm_dir_init(kl[1], D_u + D_r, D_e),
        "l1_f": lstm_dir_init(kl[2], 2 * D_e, D_e),
        "l1_b": lstm_dir_init(kl[3], 2 * D_e, D_e),
    }
    return {
        "emo": emo,
        "common": common,
        "lstm": lstm,
        "linear": _linear_init(keys[11], 2 * D_e, D_h),
        "smax_fc": _linear_init(keys[12], D_h, n_classes),
    }


# ---------------------------------------------------------------------------
if __name__ == "__main__":
    key = jax.random.PRNGKey(0)
    # Small shapes consistent with the module.
    T, B, P = 4, 2, 2                 # seq_len, batch, parties
    D_u = D_k = 64                    # utterance / commonsense feature dims (must match)
    D_r = 32                          # commonsense recurrent state dim
    D_e = 32                          # LSTM hidden size
    D_h = 32                          # classifier hidden size
    N_s = 2                           # number of speakers
    n_classes = 6
    emo_dim = 1024                    # Emoformer_t(1024) is hard-coded in the module

    kp, kd = jax.random.split(key)
    params = init_params(kp, D_u=D_u, D_k=D_k, D_r=D_r, D_e=D_e, D_h=D_h,
                         N_s=N_s, n_classes=n_classes, emo_dim=emo_dim)

    ks = jax.random.split(kd, 10)
    r1 = jax.random.normal(ks[0], (T, B, emo_dim), jnp.float32)
    r2 = jax.random.normal(ks[1], (T, B, emo_dim), jnp.float32)
    r3 = jax.random.normal(ks[2], (T, B, emo_dim), jnp.float32)
    r4 = jax.random.normal(ks[3], (T, B, emo_dim), jnp.float32)
    a = jax.random.normal(ks[4], (T, B, D_u), jnp.float32)        # unused by the cell
    UU = jax.random.normal(ks[5], (T, B, D_u), jnp.float32)
    SK = jax.random.normal(ks[6], (T, B, D_k), jnp.float32)
    NU = jax.random.normal(ks[7], (T, B, D_u), jnp.float32)
    LK = jax.random.normal(ks[8], (T, B, D_k), jnp.float32)
    speakers = jax.random.randint(ks[9], (T, B), 0, P)
    qmask = jax.nn.one_hot(speakers, P, dtype=jnp.float32)        # (T, B, P)
    umask = jnp.ones((B, T), jnp.float32)                         # unused (attention=False)

    fwd = jax.jit(lstm_model_forward)
    log_prob, alpha, alpha_f, alpha_b = fwd(params, r1, r2, r3, r4, a, qmask,
                                            umask, UU, SK, NU, LK)
    log_prob = jax.block_until_ready(log_prob)

    # Also exercise the Emoformer branch end-to-end (its outputs are discarded by
    # the reference forward, so the jitted model DCEs them).
    emo_u, emo_r = jax.jit(emoformer_forward)(params["emo"], r1, r2, r3, r4)
    jax.block_until_ready((emo_u, emo_r))

    assert log_prob.shape == (T, B, n_classes), log_prob.shape
    assert emo_u.shape == (T, B, 500) and emo_r.shape == (T, B, 100)
    assert bool(jnp.all(jnp.isfinite(log_prob)))
    assert bool(jnp.all(jnp.isfinite(emo_u))) and bool(jnp.all(jnp.isfinite(emo_r)))
    # log-softmax rows must normalize to 1 in probability space.
    assert bool(jnp.allclose(jnp.sum(jnp.exp(log_prob), axis=-1), 1.0, atol=1e-4))
    print("KERNEL_OK")
</pallas_src>

<mosaic_0001>
module attributes {stable_mosaic.version = 11 : i64} {
  func.func @_linear_kernel(%arg0: i32, %arg1: memref<8x128xf32, #tpu.memory_space<vmem>>, %arg2: memref<128x128xf32, #tpu.memory_space<vmem>>, %arg3: memref<1x128xf32, #tpu.memory_space<vmem>>, %arg4: memref<8x128xf32, #tpu.memory_space<vmem>>) attributes {dimension_semantics = [#tpu.dimension_semantics<parallel>], iteration_bounds = array<i64: 1>, scalar_prefetch = 0 : i64, scratch_operands = 0 : i64, tpu.core_type = #tpu.core_type<tc>, window_params = [{transform_indices = @transform_0, window_bounds = array<i64: 8, 128>}, {pipeline_mode = #tpu.pipeline_mode<synchronous>, transform_indices = @transform_1, window_bounds = array<i64: 128, 128>}, {pipeline_mode = #tpu.pipeline_mode<synchronous>, transform_indices = @transform_2, window_bounds = array<i64: 1, 128>}, {transform_indices = @transform_3, window_bounds = array<i64: 8, 128>}]} {
    %c0 = arith.constant 0 : index
    %c0_0 = arith.constant 0 : index
    %0 = vector.load %arg1[%c0, %c0_0] : memref<8x128xf32, #tpu.memory_space<vmem>>, vector<8x128xf32>
    %c0_1 = arith.constant 0 : index
    %c0_2 = arith.constant 0 : index
    %1 = vector.load %arg2[%c0_1, %c0_2] : memref<128x128xf32, #tpu.memory_space<vmem>>, vector<128x128xf32>
    %cst = arith.constant dense<0.000000e+00> : vector<8x128xf32>
    %2 = tpu.matmul %0, %1, %cst {dimension_numbers = #tpu.dot_dimension_numbers<[1], [0], [0], [1], [0, 0, 1, 1], [], []>} : vector<8x128xf32>, vector<128x128xf32>, vector<8x128xf32> -> vector<8x128xf32>
    %c0_3 = arith.constant 0 : index
    %c0_4 = arith.constant 0 : index
    %3 = vector.load %arg3[%c0_3, %c0_4] : memref<1x128xf32, #tpu.memory_space<vmem>>, vector<1x128xf32>
    %4 = vector.broadcast %3 : vector<1x128xf32> to vector<8x128xf32>
    %5 = arith.addf %2, %4 : vector<8x128xf32>
    %c0_5 = arith.constant 0 : index
    %c0_6 = arith.constant 0 : index
    %6 = vector.load %arg4[%c0_5, %c0_6] : memref<8x128xf32, #tpu.memory_space<vmem>>, vector<8x128xf32>
    tpu.vector_store %arg4[%c0_5, %c0_6], %5 {strides = array<i32>} : memref<8x128xf32, #tpu.memory_space<vmem>>, vector<8x128xf32>,
    return
  }
  func.func @transform_0(%arg0: i32) -> (i32, i32) {
    %c0_i32 = arith.constant 0 : i32
    %c0_i32_0 = arith.constant 0 : i32
    return %arg0, %c0_i32 : i32, i32
  }
  func.func @transform_1(%arg0: i32) -> (i32, i32) {
    %c0_i32 = arith.constant 0 : i32
    %c0_i32_0 = arith.constant 0 : i32
    %c0_i32_1 = arith.constant 0 : i32
    return %c0_i32, %c0_i32_0 : i32, i32
  }
  func.func @transform_2(%arg0: i32) -> (i32, i32) {
    %c0_i32 = arith.constant 0 : i32
    %c0_i32_0 = arith.constant 0 : i32
    %c0_i32_1 = arith.constant 0 : i32
    return %c0_i32, %c0_i32_0 : i32, i32
  }
  func.func @transform_3(%arg0: i32) -> (i32, i32) {
    %c0_i32 = arith.constant 0 : i32
    %c0_i32_0 = arith.constant 0 : i32
    return %arg0, %c0_i32 : i32, i32
  }
}

module attributes {stable_mosaic.version = 11 : i64} {
  func.func @_attn_core_kernel(%arg0: memref<2x1x64xf32, #tpu.memory_space<vmem>>, %arg1: memref<2x1x64xf32, #tpu.memory_space<vmem>>, %arg2: memref<2x1x64xf32, #tpu.memory_space<vmem>>) attributes {dimension_semantics = [], scalar_prefetch = 0 : i64, scratch_operands = 0 : i64, tpu.core_type = #tpu.core_type<tc>} {
    %c0 = arith.constant 0 : index
    %c0_0 = arith.constant 0 : index
    %c0_1 = arith.constant 0 : index
    %0 = vector.load %arg0[%c0, %c0_0, %c0_1] : memref<2x1x64xf32, #tpu.memory_space<vmem>>, vector<2x1x64xf32>
    %c0_2 = arith.constant 0 : index
    %c0_3 = arith.constant 0 : index
    %c0_4 = arith.constant 0 : index
    %1 = vector.load %arg1[%c0_2, %c0_3, %c0_4] : memref<2x1x64xf32, #tpu.memory_space<vmem>>, vector<2x1x64xf32>
    %2 = vector.shape_cast %0 : vector<2x1x64xf32> to vector<2x1x1x64xf32>
    %3 = vector.shape_cast %1 : vector<2x1x64xf32> to vector<2x1x1x64xf32>
    %4 = arith.mulf %2, %3 : vector<2x1x1x64xf32>
    %cst = arith.constant dense<0.000000e+00> : vector<2x1x1xf32>
    %5 = vector.multi_reduction <add>, %4, %cst [3] : vector<2x1x1x64xf32> to vector<2x1x1xf32>
    %cst_5 = arith.constant dense<0xFF800000> : vector<1x1xf32>
    %6 = vector.multi_reduction <maximumf>, %5, %cst_5 [0] : vector<2x1x1xf32> to vector<1x1xf32>
    %7 = vector.shape_cast %6 : vector<1x1xf32> to vector<1x1x1xf32>
    %8 = vector.broadcast %7 : vector<1x1x1xf32> to vector<2x1x1xf32>
    %9 = arith.subf %5, %8 : vector<2x1x1xf32>
    %10 = math.exp %9 : vector<2x1x1xf32>
    %cst_6 = arith.constant dense<0.000000e+00> : vector<1x1xf32>
    %11 = vector.multi_reduction <add>, %10, %cst_6 [0] : vector<2x1x1xf32> to vector<1x1xf32>
    %12 = vector.shape_cast %11 : vector<1x1xf32> to vector<1x1x1xf32>
    %13 = vector.broadcast %12 : vector<1x1x1xf32> to vector<2x1x1xf32>
    %14 = arith.divf %10, %13 : vector<2x1x1xf32>
    %15 = vector.shape_cast %14 : vector<2x1x1xf32> to vector<2x1x1x1xf32>
    %16 = vector.shape_cast %1 : vector<2x1x64xf32> to vector<2x1x1x64xf32>
    %17 = vector.broadcast %15 : vector<2x1x1x1xf32> to vector<2x1x1x64xf32>
    %18 = arith.mulf %17, %16 : vector<2x1x1x64xf32>
    %cst_7 = arith.constant dense<0.000000e+00> : vector<2x1x64xf32>
    %19 = vector.multi_reduction <add>, %18, %cst_7 [2] : vector<2x1x1x64xf32> to vector<2x1x64xf32>
    %c0_8 = arith.constant 0 : index
    %c0_9 = arith.constant 0 : index
    %c0_10 = arith.constant 0 : index
    %20 = vector.load %arg2[%c0_8, %c0_9, %c0_10] : memref<2x1x64xf32, #tpu.memory_space<vmem>>, vector<2x1x64xf32>
    tpu.vector_store %arg2[%c0_8, %c0_9, %c0_10], %19 {strides = array<i32>} : memref<2x1x64xf32, #tpu.memory_space<vmem>>, vector<2x1x64xf32>,
    return
  }
}

module attributes {stable_mosaic.version = 11 : i64} {
  func.func @_gru_cell_kernel(%arg0: memref<2x64xf32, #tpu.memory_space<vmem>>, %arg1: memref<2x32xf32, #tpu.memory_space<vmem>>, %arg2: memref<2x96x64xf32, #tpu.memory_space<vmem>>, %arg3: memref<2x96x32xf32, #tpu.memory_space<vmem>>, %arg4: memref<2x96xf32, #tpu.memory_space<vmem>>, %arg5: memref<2x96xf32, #tpu.memory_space<vmem>>, %arg6: memref<2x32xf32, #tpu.memory_space<vmem>>) attributes {dimension_semantics = [], scalar_prefetch = 0 : i64, scratch_operands = 0 : i64, tpu.core_type = #tpu.core_type<tc>} {
    %c0 = arith.constant 0 : index
    %c0_0 = arith.constant 0 : index
    %0 = vector.load %arg0[%c0, %c0_0] : memref<2x64xf32, #tpu.memory_space<vmem>>, vector<2x64xf32>
    %c0_1 = arith.constant 0 : index
    %c0_2 = arith.constant 0 : index
    %1 = vector.load %arg1[%c0_1, %c0_2] : memref<2x32xf32, #tpu.memory_space<vmem>>, vector<2x32xf32>
    %2 = vector.shape_cast %0 : vector<2x64xf32> to vector<2x1x64xf32>
    %c0_3 = arith.constant 0 : index
    %c0_4 = arith.constant 0 : index
    %c0_5 = arith.constant 0 : index
    %3 = vector.load %arg2[%c0_3, %c0_4, %c0_5] : memref<2x96x64xf32, #tpu.memory_space<vmem>>, vector<2x96x64xf32>
    %4 = vector.broadcast %2 : vector<2x1x64xf32> to vector<2x96x64xf32>
    %5 = arith.mulf %4, %3 : vector<2x96x64xf32>
    %cst = arith.constant dense<0.000000e+00> : vector<2x96xf32>
    %6 = vector.multi_reduction <add>, %5, %cst [2] : vector<2x96x64xf32> to vector<2x96xf32>
    %c0_6 = arith.constant 0 : index
    %c0_7 = arith.constant 0 : index
    %7 = vector.load %arg4[%c0_6, %c0_7] : memref<2x96xf32, #tpu.memory_space<vmem>>, vector<2x96xf32>
    %8 = arith.addf %6, %7 : vector<2x96xf32>
    %9 = vector.shape_cast %1 : vector<2x32xf32> to vector<2x1x32xf32>
    %c0_8 = arith.constant 0 : index
    %c0_9 = arith.constant 0 : index
    %c0_10 = arith.constant 0 : index
    %10 = vector.load %arg3[%c0_8, %c0_9, %c0_10] : memref<2x96x32xf32, #tpu.memory_space<vmem>>, vector<2x96x32xf32>
    %11 = vector.broadcast %9 : vector<2x1x32xf32> to vector<2x96x32xf32>
    %12 = arith.mulf %11, %10 : vector<2x96x32xf32>
    %cst_11 = arith.constant dense<0.000000e+00> : vector<2x96xf32>
    %13 = vector.multi_reduction <add>, %12, %cst_11 [2] : vector<2x96x32xf32> to vector<2x96xf32>
    %c0_12 = arith.constant 0 : index
    %c0_13 = arith.constant 0 : index
    %14 = vector.load %arg5[%c0_12, %c0_13] : memref<2x96xf32, #tpu.memory_space<vmem>>, vector<2x96xf32>
    %15 = arith.addf %13, %14 : vector<2x96xf32>
    %16 = vector.extract_strided_slice %8 {offsets = [0, 0], sizes = [2, 32], strides = [1, 1]} : vector<2x96xf32> to vector<2x32xf32>
    %17 = vector.extract_strided_slice %15 {offsets = [0, 0], sizes = [2, 32], strides = [1, 1]} : vector<2x96xf32> to vector<2x32xf32>
    %18 = arith.addf %16, %17 : vector<2x32xf32>
    %19 = arith.negf %18 : vector<2x32xf32>
    %20 = math.exp %19 : vector<2x32xf32>
    %cst_14 = arith.constant 1.000000e+00 : f32
    %21 = vector.broadcast %cst_14 : f32 to vector<2x32xf32>
    %22 = arith.addf %21, %20 : vector<2x32xf32>
    %23 = arith.divf %21, %22 : vector<2x32xf32>
    %24 = vector.extract_strided_slice %8 {offsets = [0, 32], sizes = [2, 32], strides = [1, 1]} : vector<2x96xf32> to vector<2x32xf32>
    %25 = vector.extract_strided_slice %15 {offsets = [0, 32], sizes = [2, 32], strides = [1, 1]} : vector<2x96xf32> to vector<2x32xf32>
    %26 = arith.addf %24, %25 : vector<2x32xf32>
    %27 = arith.negf %26 : vector<2x32xf32>
    %28 = math.exp %27 : vector<2x32xf32>
    %cst_15 = arith.constant 1.000000e+00 : f32
    %29 = vector.broadcast %cst_15 : f32 to vector<2x32xf32>
    %30 = arith.addf %29, %28 : vector<2x32xf32>
    %31 = arith.divf %29, %30 : vector<2x32xf32>
    %32 = vector.extract_strided_slice %8 {offsets = [0, 64], sizes = [2, 32], strides = [1, 1]} : vector<2x96xf32> to vector<2x32xf32>
    %33 = vector.extract_strided_slice %15 {offsets = [0, 64], sizes = [2, 32], strides = [1, 1]} : vector<2x96xf32> to vector<2x32xf32>
    %34 = arith.mulf %23, %33 : vector<2x32xf32>
    %35 = arith.addf %32, %34 : vector<2x32xf32>
    %36 = math.tanh %35 : vector<2x32xf32>
    %cst_16 = arith.constant 1.000000e+00 : f32
    %37 = vector.broadcast %cst_16 : f32 to vector<2x32xf32>
    %38 = arith.subf %37, %31 : vector<2x32xf32>
    %39 = arith.mulf %38, %36 : vector<2x32xf32>
    %40 = arith.mulf %31, %1 : vector<2x32xf32>
    %41 = arith.addf %39, %40 : vector<2x32xf32>
    %c0_17 = arith.constant 0 : index
    %c0_18 = arith.constant 0 : index
    %42 = vector.load %arg6[%c0_17, %c0_18] : memref<2x32xf32, #tpu.memory_space<vmem>>, vector<2x32xf32>
    tpu.vector_store %arg6[%c0_17, %c0_18], %41 {strides = array<i32>} : memref<2x32xf32, #tpu.memory_space<vmem>>, vector<2x32xf32>,
    return
  }
}

module attributes {stable_mosaic.version = 11 : i64} {
  func.func @_lstm_dir_kernel(%arg0: i32, %arg1: memref<1x2x64xf32, #tpu.memory_space<vmem>>, %arg2: memref<64x128xf32, #tpu.memory_space<vmem>>, %arg3: memref<32x128xf32, #tpu.memory_space<vmem>>, %arg4: memref<1x128xf32, #tpu.memory_space<vmem>>, %arg5: memref<1x2x32xf32, #tpu.memory_space<vmem>>, %arg6: memref<2x32xf32, #tpu.memory_space<vmem>>, %arg7: memref<2x32xf32, #tpu.memory_space<vmem>>) attributes {dimension_semantics = [#tpu.dimension_semantics<arbitrary>], iteration_bounds = array<i64: 4>, scalar_prefetch = 0 : i64, scratch_operands = 2 : i64, tpu.core_type = #tpu.core_type<tc>, window_params = [{transform_indices = @transform_0, window_bounds = array<i64: 1, 2, 64>}, {pipeline_mode = #tpu.pipeline_mode<synchronous>, transform_indices = @transform_1, window_bounds = array<i64: 64, 128>}, {pipeline_mode = #tpu.pipeline_mode<synchronous>, transform_indices = @transform_2, window_bounds = array<i64: 32, 128>}, {pipeline_mode = #tpu.pipeline_mode<synchronous>, transform_indices = @transform_3, window_bounds = array<i64: 1, 128>}, {transform_indices = @transform_4, window_bounds = array<i64: 1, 2, 32>}]} {
    %c0_i32 = arith.constant 0 : i32
    %0 = arith.cmpi eq, %arg0, %c0_i32 : i32
    %1 = arith.extui %0 : i1 to i32
    %c0_i32_0 = arith.constant 0 : i32
    %2 = arith.cmpi ne, %1, %c0_i32_0 : i32
    scf.if %2 {
      %cst_24 = arith.constant 0.000000e+00 : f32
      %45 = vector.broadcast %cst_24 : f32 to vector<2x32xf32>
      %c0_25 = arith.constant 0 : index
      %c0_26 = arith.constant 0 : index
      %46 = vector.load %arg6[%c0_25, %c0_26] : memref<2x32xf32, #tpu.memory_space<vmem>>, vector<2x32xf32>
      tpu.vector_store %arg6[%c0_25, %c0_26], %45 {strides = array<i32>} : memref<2x32xf32, #tpu.memory_space<vmem>>, vector<2x32xf32>,
      %cst_27 = arith.constant 0.000000e+00 : f32
      %47 = vector.broadcast %cst_27 : f32 to vector<2x32xf32>
      %c0_28 = arith.constant 0 : index
      %c0_29 = arith.constant 0 : index
      %48 = vector.load %arg7[%c0_28, %c0_29] : memref<2x32xf32, #tpu.memory_space<vmem>>, vector<2x32xf32>
      tpu.vector_store %arg7[%c0_28, %c0_29], %47 {strides = array<i32>} : memref<2x32xf32, #tpu.memory_space<vmem>>, vector<2x32xf32>,
    } else {
    }
    %c0 = arith.constant 0 : index
    %c0_1 = arith.constant 0 : index
    %c0_2 = arith.constant 0 : index
    %3 = vector.load %arg1[%c0, %c0_1, %c0_2] : memref<1x2x64xf32, #tpu.memory_space<vmem>>, vector<1x2x64xf32>
    %4 = vector.shape_cast %3 : vector<1x2x64xf32> to vector<2x64xf32>
    %c0_3 = arith.constant 0 : index
    %c0_4 = arith.constant 0 : index
    %5 = vector.load %arg2[%c0_3, %c0_4] : memref<64x128xf32, #tpu.memory_space<vmem>>, vector<64x128xf32>
    %cst = arith.constant dense<0.000000e+00> : vector<2x128xf32>
    %6 = tpu.matmul %4, %5, %cst {dimension_numbers = #tpu.dot_dimension_numbers<[1], [0], [0], [1], [0, 0, 1, 1], [], []>} : vector<2x64xf32>, vector<64x128xf32>, vector<2x128xf32> -> vector<2x128xf32>
    %c0_5 = arith.constant 0 : index
    %c0_6 = arith.constant 0 : index
    %7 = vector.load %arg6[%c0_5, %c0_6] : memref<2x32xf32, #tpu.memory_space<vmem>>, vector<2x32xf32>
    %c0_7 = arith.constant 0 : index
    %c0_8 = arith.constant 0 : index
    %8 = vector.load %arg3[%c0_7, %c0_8] : memref<32x128xf32, #tpu.memory_space<vmem>>, vector<32x128xf32>
    %cst_9 = arith.constant dense<0.000000e+00> : vector<2x128xf32>
    %9 = tpu.matmul %7, %8, %cst_9 {dimension_numbers = #tpu.dot_dimension_numbers<[1], [0], [0], [1], [0, 0, 1, 1], [], []>} : vector<2x32xf32>, vector<32x128xf32>, vector<2x128xf32> -> vector<2x128xf32>
    %10 = arith.addf %6, %9 : vector<2x128xf32>
    %c0_10 = arith.constant 0 : index
    %c0_11 = arith.constant 0 : index
    %11 = vector.load %arg4[%c0_10, %c0_11] : memref<1x128xf32, #tpu.memory_space<vmem>>, vector<1x128xf32>
    %12 = vector.broadcast %11 : vector<1x128xf32> to vector<2x128xf32>
    %13 = arith.addf %10, %12 : vector<2x128xf32>
    %14 = vector.extract_strided_slice %13 {offsets = [0, 0], sizes = [2, 32], strides = [1, 1]} : vector<2x128xf32> to vector<2x32xf32>
    %15 = arith.negf %14 : vector<2x32xf32>
    %16 = math.exp %15 : vector<2x32xf32>
    %cst_12 = arith.constant 1.000000e+00 : f32
    %17 = vector.broadcast %cst_12 : f32 to vector<2x32xf32>
    %18 = arith.addf %17, %16 : vector<2x32xf32>
    %19 = arith.divf %17, %18 : vector<2x32xf32>
    %20 = vector.extract_strided_slice %13 {offsets = [0, 32], sizes = [2, 32], strides = [1, 1]} : vector<2x128xf32> to vector<2x32xf32>
    %21 = arith.negf %20 : vector<2x32xf32>
    %22 = math.exp %21 : vector<2x32xf32>
    %cst_13 = arith.constant 1.000000e+00 : f32
    %23 = vector.broadcast %cst_13 : f32 to vector<2x32xf32>
    %24 = arith.addf %23, %22 : vector<2x32xf32>
    %25 = arith.divf %23, %24 : vector<2x32xf32>
    %26 = vector.extract_strided_slice %13 {offsets = [0, 64], sizes = [2, 32], strides = [1, 1]} : vector<2x128xf32> to vector<2x32xf32>
    %27 = math.tanh %26 : vector<2x32xf32>
    %28 = vector.extract_strided_slice %13 {offsets = [0, 96], sizes = [2, 32], strides = [1, 1]} : vector<2x128xf32> to vector<2x32xf32>
    %29 = arith.negf %28 : vector<2x32xf32>
    %30 = math.exp %29 : vector<2x32xf32>
    %cst_14 = arith.constant 1.000000e+00 : f32
    %31 = vector.broadcast %cst_14 : f32 to vector<2x32xf32>
    %32 = arith.addf %31, %30 : vector<2x32xf32>
    %33 = arith.divf %31, %32 : vector<2x32xf32>
    %c0_15 = arith.constant 0 : index
    %c0_16 = arith.constant 0 : index
    %34 = vector.load %arg7[%c0_15, %c0_16] : memref<2x32xf32, #tpu.memory_space<vmem>>, vector<2x32xf32>
    %35 = arith.mulf %25, %34 : vector<2x32xf32>
    %36 = arith.mulf %19, %27 : vector<2x32xf32>
    %37 = arith.addf %35, %36 : vector<2x32xf32>
    %38 = math.tanh %37 : vector<2x32xf32>
    %39 = arith.mulf %33, %38 : vector<2x32xf32>
    %c0_17 = arith.constant 0 : index
    %c0_18 = arith.constant 0 : index
    %40 = vector.load %arg7[%c0_17, %c0_18] : memref<2x32xf32, #tpu.memory_space<vmem>>, vector<2x32xf32>
    tpu.vector_store %arg7[%c0_17, %c0_18], %37 {strides = array<i32>} : memref<2x32xf32, #tpu.memory_space<vmem>>, vector<2x32xf32>,
    %c0_19 = arith.constant 0 : index
    %c0_20 = arith.constant 0 : index
    %41 = vector.load %arg6[%c0_19, %c0_20] : memref<2x32xf32, #tpu.memory_space<vmem>>, vector<2x32xf32>
    tpu.vector_store %arg6[%c0_19, %c0_20], %39 {strides = array<i32>} : memref<2x32xf32, #tpu.memory_space<vmem>>, vector<2x32xf32>,
    %c0_21 = arith.constant 0 : index
    %c0_22 = arith.constant 0 : index
    %c0_23 = arith.constant 0 : index
    %42 = vector.load %arg5[%c0_21, %c0_22, %c0_23] : memref<1x2x32xf32, #tpu.memory_space<vmem>>, vector<1x2x32xf32>
    %43 = vector.shape_cast %42 : vector<1x2x32xf32> to vector<2x32xf32>
    %44 = vector.shape_cast %39 : vector<2x32xf32> to vector<1x2x32xf32>
    tpu.vector_store %arg5[%c0_21, %c0_22, %c0_23], %44 {strides = array<i32>} : memref<1x2x32xf32, #tpu.memory_space<vmem>>, vector<1x2x32xf32>,
    return
  }
  func.func @transform_0(%arg0: i32) -> (i32, i32, i32) {
    %c0_i32 = arith.constant 0 : i32
    %c0_i32_0 = arith.constant 0 : i32
    %c0_i32_1 = arith.constant 0 : i32
    return %arg0, %c0_i32, %c0_i32_0 : i32, i32, i32
  }
  func.func @transform_1(%arg0: i32) -> (i32, i32) {
    %c0_i32 = arith.constant 0 : i32
    %c0_i32_0 = arith.constant 0 : i32
    %c0_i32_1 = arith.constant 0 : i32
    return %c0_i32, %c0_i32_0 : i32, i32
  }
  func.func @transform_2(%arg0: i32) -> (i32, i32) {
    %c0_i32 = arith.constant 0 : i32
    %c0_i32_0 = arith.constant 0 : i32
    %c0_i32_1 = arith.constant 0 : i32
    return %c0_i32, %c0_i32_0 : i32, i32
  }
  func.func @transform_3(%arg0: i32) -> (i32, i32) {
    %c0_i32 = arith.constant 0 : i32
    %c0_i32_0 = arith.constant 0 : i32
    %c0_i32_1 = arith.constant 0 : i32
    return %c0_i32, %c0_i32_0 : i32, i32
  }
  func.func @transform_4(%arg0: i32) -> (i32, i32, i32) {
    %c0_i32 = arith.constant 0 : i32
    %c0_i32_0 = arith.constant 0 : i32
    %c0_i32_1 = arith.constant 0 : i32
    return %arg0, %c0_i32, %c0_i32_0 : i32, i32, i32
  }
}

module attributes {stable_mosaic.version = 11 : i64} {
  func.func @_lstm_dir_kernel(%arg0: i32, %arg1: memref<1x2x96xf32, #tpu.memory_space<vmem>>, %arg2: memref<96x128xf32, #tpu.memory_space<vmem>>, %arg3: memref<32x128xf32, #tpu.memory_space<vmem>>, %arg4: memref<1x128xf32, #tpu.memory_space<vmem>>, %arg5: memref<1x2x32xf32, #tpu.memory_space<vmem>>, %arg6: memref<2x32xf32, #tpu.memory_space<vmem>>, %arg7: memref<2x32xf32, #tpu.memory_space<vmem>>) attributes {dimension_semantics = [#tpu.dimension_semantics<arbitrary>], iteration_bounds = array<i64: 4>, scalar_prefetch = 0 : i64, scratch_operands = 2 : i64, tpu.core_type = #tpu.core_type<tc>, window_params = [{transform_indices = @transform_0, window_bounds = array<i64: 1, 2, 96>}, {pipeline_mode = #tpu.pipeline_mode<synchronous>, transform_indices = @transform_1, window_bounds = array<i64: 96, 128>}, {pipeline_mode = #tpu.pipeline_mode<synchronous>, transform_indices = @transform_2, window_bounds = array<i64: 32, 128>}, {pipeline_mode = #tpu.pipeline_mode<synchronous>, transform_indices = @transform_3, window_bounds = array<i64: 1, 128>}, {transform_indices = @transform_4, window_bounds = array<i64: 1, 2, 32>}]} {
    %c0_i32 = arith.constant 0 : i32
    %0 = arith.cmpi eq, %arg0, %c0_i32 : i32
    %1 = arith.extui %0 : i1 to i32
    %c0_i32_0 = arith.constant 0 : i32
    %2 = arith.cmpi ne, %1, %c0_i32_0 : i32
    scf.if %2 {
      %cst_24 = arith.constant 0.000000e+00 : f32
      %45 = vector.broadcast %cst_24 : f32 to vector<2x32xf32>
      %c0_25 = arith.constant 0 : index
      %c0_26 = arith.constant 0 : index
      %46 = vector.load %arg6[%c0_25, %c0_26] : memref<2x32xf32, #tpu.memory_space<vmem>>, vector<2x32xf32>
      tpu.vector_store %arg6[%c0_25, %c0_26], %45 {strides = array<i32>} : memref<2x32xf32, #tpu.memory_space<vmem>>, vector<2x32xf32>,
      %cst_27 = arith.constant 0.000000e+00 : f32
      %47 = vector.broadcast %cst_27 : f32 to vector<2x32xf32>
      %c0_28 = arith.constant 0 : index
      %c0_29 = arith.constant 0 : index
      %48 = vector.load %arg7[%c0_28, %c0_29] : memref<2x32xf32, #tpu.memory_space<vmem>>, vector<2x32xf32>
      tpu.vector_store %arg7[%c0_28, %c0_29], %47 {strides = array<i32>} : memref<2x32xf32, #tpu.memory_space<vmem>>, vector<2x32xf32>,
    } else {
    }
    %c0 = arith.constant 0 : index
    %c0_1 = arith.constant 0 : index
    %c0_2 = arith.constant 0 : index
    %3 = vector.load %arg1[%c0, %c0_1, %c0_2] : memref<1x2x96xf32, #tpu.memory_space<vmem>>, vector<1x2x96xf32>
    %4 = vector.shape_cast %3 : vector<1x2x96xf32> to vector<2x96xf32>
    %c0_3 = arith.constant 0 : index
    %c0_4 = arith.constant 0 : index
    %5 = vector.load %arg2[%c0_3, %c0_4] : memref<96x128xf32, #tpu.memory_space<vmem>>, vector<96x128xf32>
    %cst = arith.constant dense<0.000000e+00> : vector<2x128xf32>
    %6 = tpu.matmul %4, %5, %cst {dimension_numbers = #tpu.dot_dimension_numbers<[1], [0], [0], [1], [0, 0, 1, 1], [], []>} : vector<2x96xf32>, vector<96x128xf32>, vector<2x128xf32> -> vector<2x128xf32>
    %c0_5 = arith.constant 0 : index
    %c0_6 = arith.constant 0 : index
    %7 = vector.load %arg6[%c0_5, %c0_6] : memref<2x32xf32, #tpu.memory_space<vmem>>, vector<2x32xf32>
    %c0_7 = arith.constant 0 : index
    %c0_8 = arith.constant 0 : index
    %8 = vector.load %arg3[%c0_7, %c0_8] : memref<32x128xf32, #tpu.memory_space<vmem>>, vector<32x128xf32>
    %cst_9 = arith.constant dense<0.000000e+00> : vector<2x128xf32>
    %9 = tpu.matmul %7, %8, %cst_9 {dimension_numbers = #tpu.dot_dimension_numbers<[1], [0], [0], [1], [0, 0, 1, 1], [], []>} : vector<2x32xf32>, vector<32x128xf32>, vector<2x128xf32> -> vector<2x128xf32>
    %10 = arith.addf %6, %9 : vector<2x128xf32>
    %c0_10 = arith.constant 0 : index
    %c0_11 = arith.constant 0 : index
    %11 = vector.load %arg4[%c0_10, %c0_11] : memref<1x128xf32, #tpu.memory_space<vmem>>, vector<1x128xf32>
    %12 = vector.broadcast %11 : vector<1x128xf32> to vector<2x128xf32>
    %13 = arith.addf %10, %12 : vector<2x128xf32>
    %14 = vector.extract_strided_slice %13 {offsets = [0, 0], sizes = [2, 32], strides = [1, 1]} : vector<2x128xf32> to vector<2x32xf32>
    %15 = arith.negf %14 : vector<2x32xf32>
    %16 = math.exp %15 : vector<2x32xf32>
    %cst_12 = arith.constant 1.000000e+00 : f32
    %17 = vector.broadcast %cst_12 : f32 to vector<2x32xf32>
    %18 = arith.addf %17, %16 : vector<2x32xf32>
    %19 = arith.divf %17, %18 : vector<2x32xf32>
    %20 = vector.extract_strided_slice %13 {offsets = [0, 32], sizes = [2, 32], strides = [1, 1]} : vector<2x128xf32> to vector<2x32xf32>
    %21 = arith.negf %20 : vector<2x32xf32>
    %22 = math.exp %21 : vector<2x32xf32>
    %cst_13 = arith.constant 1.000000e+00 : f32
    %23 = vector.broadcast %cst_13 : f32 to vector<2x32xf32>
    %24 = arith.addf %23, %22 : vector<2x32xf32>
    %25 = arith.divf %23, %24 : vector<2x32xf32>
    %26 = vector.extract_strided_slice %13 {offsets = [0, 64], sizes = [2, 32], strides = [1, 1]} : vector<2x128xf32> to vector<2x32xf32>
    %27 = math.tanh %26 : vector<2x32xf32>
    %28 = vector.extract_strided_slice %13 {offsets = [0, 96], sizes = [2, 32], strides = [1, 1]} : vector<2x128xf32> to vector<2x32xf32>
    %29 = arith.negf %28 : vector<2x32xf32>
    %30 = math.exp %29 : vector<2x32xf32>
    %cst_14 = arith.constant 1.000000e+00 : f32
    %31 = vector.broadcast %cst_14 : f32 to vector<2x32xf32>
    %32 = arith.addf %31, %30 : vector<2x32xf32>
    %33 = arith.divf %31, %32 : vector<2x32xf32>
    %c0_15 = arith.constant 0 : index
    %c0_16 = arith.constant 0 : index
    %34 = vector.load %arg7[%c0_15, %c0_16] : memref<2x32xf32, #tpu.memory_space<vmem>>, vector<2x32xf32>
    %35 = arith.mulf %25, %34 : vector<2x32xf32>
    %36 = arith.mulf %19, %27 : vector<2x32xf32>
    %37 = arith.addf %35, %36 : vector<2x32xf32>
    %38 = math.tanh %37 : vector<2x32xf32>
    %39 = arith.mulf %33, %38 : vector<2x32xf32>
    %c0_17 = arith.constant 0 : index
    %c0_18 = arith.constant 0 : index
    %40 = vector.load %arg7[%c0_17, %c0_18] : memref<2x32xf32, #tpu.memory_space<vmem>>, vector<2x32xf32>
    tpu.vector_store %arg7[%c0_17, %c0_18], %37 {strides = array<i32>} : memref<2x32xf32, #tpu.memory_space<vmem>>, vector<2x32xf32>,
    %c0_19 = arith.constant 0 : index
    %c0_20 = arith.constant 0 : index
    %41 = vector.load %arg6[%c0_19, %c0_20] : memref<2x32xf32, #tpu.memory_space<vmem>>, vector<2x32xf32>
    tpu.vector_store %arg6[%c0_19, %c0_20], %39 {strides = array<i32>} : memref<2x32xf32, #tpu.memory_space<vmem>>, vector<2x32xf32>,
    %c0_21 = arith.constant 0 : index
    %c0_22 = arith.constant 0 : index
    %c0_23 = arith.constant 0 : index
    %42 = vector.load %arg5[%c0_21, %c0_22, %c0_23] : memref<1x2x32xf32, #tpu.memory_space<vmem>>, vector<1x2x32xf32>
    %43 = vector.shape_cast %42 : vector<1x2x32xf32> to vector<2x32xf32>
    %44 = vector.shape_cast %39 : vector<2x32xf32> to vector<1x2x32xf32>
    tpu.vector_store %arg5[%c0_21, %c0_22, %c0_23], %44 {strides = array<i32>} : memref<1x2x32xf32, #tpu.memory_space<vmem>>, vector<1x2x32xf32>,
    return
  }
  func.func @transform_0(%arg0: i32) -> (i32, i32, i32) {
    %c0_i32 = arith.constant 0 : i32
    %c0_i32_0 = arith.constant 0 : i32
    %c0_i32_1 = arith.constant 0 : i32
    return %arg0, %c0_i32, %c0_i32_0 : i32, i32, i32
  }
  func.func @transform_1(%arg0: i32) -> (i32, i32) {
    %c0_i32 = arith.constant 0 : i32
    %c0_i32_0 = arith.constant 0 : i32
    %c0_i32_1 = arith.constant 0 : i32
    return %c0_i32, %c0_i32_0 : i32, i32
  }
  func.func @transform_2(%arg0: i32) -> (i32, i32) {
    %c0_i32 = arith.constant 0 : i32
    %c0_i32_0 = arith.constant 0 : i32
    %c0_i32_1 = arith.constant 0 : i32
    return %c0_i32, %c0_i32_0 : i32, i32
  }
  func.func @transform_3(%arg0: i32) -> (i32, i32) {
    %c0_i32 = arith.constant 0 : i32
    %c0_i32_0 = arith.constant 0 : i32
    %c0_i32_1 = arith.constant 0 : i32
    return %c0_i32, %c0_i32_0 : i32, i32
  }
  func.func @transform_4(%arg0: i32) -> (i32, i32, i32) {
    %c0_i32 = arith.constant 0 : i32
    %c0_i32_0 = arith.constant 0 : i32
    %c0_i32_1 = arith.constant 0 : i32
    return %arg0, %c0_i32, %c0_i32_0 : i32, i32, i32
  }
}

module attributes {stable_mosaic.version = 11 : i64} {
  func.func @_linear_kernel(%arg0: i32, %arg1: memref<8x128xf32, #tpu.memory_space<vmem>>, %arg2: memref<128x128xf32, #tpu.memory_space<vmem>>, %arg3: memref<1x128xf32, #tpu.memory_space<vmem>>, %arg4: memref<8x128xf32, #tpu.memory_space<vmem>>) attributes {dimension_semantics = [#tpu.dimension_semantics<parallel>], iteration_bounds = array<i64: 1>, scalar_prefetch = 0 : i64, scratch_operands = 0 : i64, tpu.core_type = #tpu.core_type<tc>, window_params = [{transform_indices = @transform_0, window_bounds = array<i64: 8, 128>}, {pipeline_mode = #tpu.pipeline_mode<synchronous>, transform_indices = @transform_1, window_bounds = array<i64: 128, 128>}, {pipeline_mode = #tpu.pipeline_mode<synchronous>, transform_indices = @transform_2, window_bounds = array<i64: 1, 128>}, {transform_indices = @transform_3, window_bounds = array<i64: 8, 128>}]} {
    %c0 = arith.constant 0 : index
    %c0_0 = arith.constant 0 : index
    %0 = vector.load %arg1[%c0, %c0_0] : memref<8x128xf32, #tpu.memory_space<vmem>>, vector<8x128xf32>
    %c0_1 = arith.constant 0 : index
    %c0_2 = arith.constant 0 : index
    %1 = vector.load %arg2[%c0_1, %c0_2] : memref<128x128xf32, #tpu.memory_space<vmem>>, vector<128x128xf32>
    %cst = arith.constant dense<0.000000e+00> : vector<8x128xf32>
    %2 = tpu.matmul %0, %1, %cst {dimension_numbers = #tpu.dot_dimension_numbers<[1], [0], [0], [1], [0, 0, 1, 1], [], []>} : vector<8x128xf32>, vector<128x128xf32>, vector<8x128xf32> -> vector<8x128xf32>
    %c0_3 = arith.constant 0 : index
    %c0_4 = arith.constant 0 : index
    %3 = vector.load %arg3[%c0_3, %c0_4] : memref<1x128xf32, #tpu.memory_space<vmem>>, vector<1x128xf32>
    %4 = vector.broadcast %3 : vector<1x128xf32> to vector<8x128xf32>
    %5 = arith.addf %2, %4 : vector<8x128xf32>
    %cst_5 = arith.constant 0.000000e+00 : f32
    %6 = vector.broadcast %cst_5 : f32 to vector<8x128xf32>
    %7 = arith.maximumf %5, %6 : vector<8x128xf32>
    %c0_6 = arith.constant 0 : index
    %c0_7 = arith.constant 0 : index
    %8 = vector.load %arg4[%c0_6, %c0_7] : memref<8x128xf32, #tpu.memory_space<vmem>>, vector<8x128xf32>
    tpu.vector_store %arg4[%c0_6, %c0_7], %7 {strides = array<i32>} : memref<8x128xf32, #tpu.memory_space<vmem>>, vector<8x128xf32>,
    return
  }
  func.func @transform_0(%arg0: i32) -> (i32, i32) {
    %c0_i32 = arith.constant 0 : i32
    %c0_i32_0 = arith.constant 0 : i32
    return %arg0, %c0_i32 : i32, i32
  }
  func.func @transform_1(%arg0: i32) -> (i32, i32) {
    %c0_i32 = arith.constant 0 : i32
    %c0_i32_0 = arith.constant 0 : i32
    %c0_i32_1 = arith.constant 0 : i32
    return %c0_i32, %c0_i32_0 : i32, i32
  }
  func.func @transform_2(%arg0: i32) -> (i32, i32) {
    %c0_i32 = arith.constant 0 : i32
    %c0_i32_0 = arith.constant 0 : i32
    %c0_i32_1 = arith.constant 0 : i32
    return %c0_i32, %c0_i32_0 : i32, i32
  }
  func.func @transform_3(%arg0: i32) -> (i32, i32) {
    %c0_i32 = arith.constant 0 : i32
    %c0_i32_0 = arith.constant 0 : i32
    return %arg0, %c0_i32 : i32, i32
  }
}

module attributes {stable_mosaic.version = 11 : i64} {
  func.func @_log_softmax_kernel(%arg0: memref<8x6xf32, #tpu.memory_space<vmem>>, %arg1: memref<8x6xf32, #tpu.memory_space<vmem>>) attributes {dimension_semantics = [], scalar_prefetch = 0 : i64, scratch_operands = 0 : i64, tpu.core_type = #tpu.core_type<tc>} {
    %c0 = arith.constant 0 : index
    %c0_0 = arith.constant 0 : index
    %0 = vector.load %arg0[%c0, %c0_0] : memref<8x6xf32, #tpu.memory_space<vmem>>, vector<8x6xf32>
    %cst = arith.constant dense<0xFF800000> : vector<8xf32>
    %1 = vector.multi_reduction <maximumf>, %0, %cst [1] : vector<8x6xf32> to vector<8xf32>
    %2 = vector.shape_cast %1 : vector<8xf32> to vector<8x1xf32>
    %3 = vector.broadcast %2 : vector<8x1xf32> to vector<8x6xf32>
    %4 = arith.subf %0, %3 : vector<8x6xf32>
    %5 = math.exp %4 : vector<8x6xf32>
    %cst_1 = arith.constant dense<0.000000e+00> : vector<8xf32>
    %6 = vector.multi_reduction <add>, %5, %cst_1 [1] : vector<8x6xf32> to vector<8xf32>
    %7 = vector.shape_cast %6 : vector<8xf32> to vector<8x1xf32>
    %8 = math.log %7 : vector<8x1xf32>
    %9 = vector.broadcast %8 : vector<8x1xf32> to vector<8x6xf32>
    %10 = arith.subf %4, %9 : vector<8x6xf32>
    %c0_2 = arith.constant 0 : index
    %c0_3 = arith.constant 0 : index
    %11 = vector.load %arg1[%c0_2, %c0_3] : memref<8x6xf32, #tpu.memory_space<vmem>>, vector<8x6xf32>
    tpu.vector_store %arg1[%c0_2, %c0_3], %10 {strides = array<i32>} : memref<8x6xf32, #tpu.memory_space<vmem>>, vector<8x6xf32>,
    return
  }
}

</mosaic_0001>

<bundles_post_ra>
// kernel: lstm_model_forward.143
= control target key start
LH: loop header
LB: loop body
LE: loop exit
PB: predicated region body
PF: predicated region fallthrough
CT: control target
= control target key end

     0   :  { %vm17_vm0 = vcmask 516096   ;;  %vm24_vm1 = vcmask 1040384   ;;  %s93_s0 = inlined_call_operand.vmem [shape: f32[2,1,64], index: 0, kind: input, shape index: {}]   ;;  %s94_s1 = inlined_call_operand.vmem [shape: f32[2,1,64], index: 1, kind: input, shape index: {}]   ;;  %s95_s2 = inlined_call_operand.vmem [shape: f32[2,1,64], index: 2, kind: output, shape index: {}]  }
   0x1   :  { %v11_v0 = vld [vmem:[%s93_s0] sm:$0x1]  ;;  %v12_v2 = vld [vmem:[%s93_s0 + $0x1] sm:$0x1] }
   0x2   :  { %v13_v1 = vld [vmem:[%s94_s1] sm:$0x1]  ;;  %v14_v4 = vld [vmem:[%s94_s1 + $0x1] sm:$0x1] }
   0x3   :  { %v15_v3 = vmul.f32 %v13_v1, %v11_v0  ;;  %v16_v5 = vmul.f32 %v14_v4, %v12_v2 }
   0x5   :  { %v18_v6 = vsel %vm17_vm0, %v15_v3, 0.0  ;;  %v21_v7 = vsel %vm17_vm0, %v16_v5, 0.0 }
   0x6   :  { %19 = vadd.xlane.f32.xlu0 %v18_v6 }
   0xa   :  { %22 = vadd.xlane.f32.xlu0 %v21_v7 }
  0x93   :  { %v20_v8 = vpop.xlane.xlu0 %19 }
  0x94   :  { %v25_v10 = vsel %vm24_vm1, %v20_v8, -inf }
  0x97   :  { %v23_v9 = vpop.xlane.xlu0 %22 }
  0x98   :  { %v26_v11 = vsel %vm24_vm1, %v23_v9, -inf }
  0x99   :  { %v27_v12 = vmax.f32 %v25_v10, %v26_v11 }
  0x9b   :  { %v28_v13 = vsub.f32 %v20_v8, %v27_v12  ;;  %v29_v14 = vsub.f32 %v23_v9, %v27_v12 }
  0x9d   :  { %v30_v15 = vmul.f32 1.442695, %v28_v13  ;;  %v32_v16 = vmul.f32 1.442695, %v29_v14 }
  0x9f   :  { %50 = vpow2.f32 %v30_v15 }
  0xa0   :  { %52 = vpow2.f32 %v32_v16 }
  0xa9   :  { %v51_v17 = vpop.eup %50 }
  0xaa   :  { %v53_v18 = vpop.eup %52  ;;  %v34_v19 = vsel %vm24_vm1, %v51_v17, 0.0 }
  0xab   :  { %v35_v20 = vsel %vm24_vm1, %v53_v18, 0.0 }
  0xac   :  { %v36_v21 = vadd.f32 %v35_v20, %v34_v19 }
  0xae   :  { %54 = vrcp.f32 %v36_v21 }
  0xb8   :  { %v55_v22 = vpop.eup %54 }
  0xb9   :  { %v38_v23 = vmul.f32 %v55_v22, %v51_v17  ;;  %v39_v24 = vmul.f32 %v55_v22, %v53_v18 }
  0xbb   :  { %v40_v25 = vmul.f32 %v38_v23, %v13_v1  ;;  %v41_v26 = vmul.f32 %v39_v24, %v14_v4 }
  0xbd   :  { %44 = vst.msk [vmem:[%s95_s2] sm:$0x1] %vm17_vm0, %v40_v25  ;;  %45 = vst.msk [vmem:[%s95_s2 + $0x1] sm:$0x1] %vm17_vm0, %v41_v26 }

// kernel: lstm_model_forward.142
= control target key start
LH: loop header
LB: loop body
LE: loop exit
PB: predicated region body
PF: predicated region fallthrough
CT: control target
= control target key end

     0   :  { %v193_v0 = vmov 0.0|0.0   ;;  %vm194_vm0 = vmmov 0   ;;  %v195_v4 = vmov 0.0   ;;  %s273_s1 = inlined_call_operand.vmem [shape: f32[128,128], index: 1, kind: input, shape index: {}]   ;;  %s274_s0 = inlined_call_operand.vmem [shape: f32[8,128], index: 0, kind: input, shape index: {}]   ;;  %s275_s2 = inlined_call_operand.vmem [shape: f32[1,128], index: 2, kind: input, shape index: {}]   ;;  %s276_s3 = inlined_call_operand.vmem [shape: f32[8,128], index: 3, kind: output, shape index: {}]  }
   0x1   :  { %166 = vmatprep.subr.bf16.mxu0 %v193_v0  ;;  %v15_v1 = vld [vmem:[%s273_s1] sm:$0xff]  ;;  %v16_v2 = vld [vmem:[%s273_s1 + $0x8] sm:$0xff]  ;;  %v17_v3 = vld [vmem:[%s273_s1 + $0x10] sm:$0xff]  ;;  %163 = vmatprep.mubr.msk.f32.mxu0 %vm194_vm0, %v195_v4 }
   0x2   :  { %v167_v5 = vpack.c.bf16 %v16_v2, %v15_v1  ;;  %v18_v6 = vld [vmem:[%s273_s1 + $0x18] sm:$0xff]  ;;  %v19_v8 = vld [vmem:[%s273_s1 + $0x20] sm:$0xff]  ;;  %v20_v9 = vld [vmem:[%s273_s1 + $0x28] sm:$0xff] }
   0x3   :  { %v170_v7 = vpack.c.bf16 %v18_v6, %v17_v3  ;;  %v173_v10 = vpack.c.bf16 %v20_v9, %v19_v8  ;;  %v21_v11 = vld [vmem:[%s273_s1 + $0x30] sm:$0xff]  ;;  %v22_v12 = vld [vmem:[%s273_s1 + $0x38] sm:$0xff]  ;;  %v23_v14 = vld [vmem:[%s273_s1 + $0x40] sm:$0xff] }
   0x4   :  { %168 = vmatpush3.bf16.msra.mxu0 %v167_v5  ;;  %v176_v13 = vpack.c.bf16 %v22_v12, %v21_v11  ;;  %v24_v15 = vld [vmem:[%s273_s1 + $0x48] sm:$0xff]  ;;  %v25_v17 = vld [vmem:[%s273_s1 + $0x50] sm:$0xff]  ;;  %v26_v18 = vld [vmem:[%s273_s1 + $0x58] sm:$0xff] }
   0x5   :  { %169 = vmatprep.subr.bf16.mxu0 %v193_v0  ;;  %v179_v16 = vpack.c.bf16 %v24_v15, %v23_v14  ;;  %v182_v19 = vpack.c.bf16 %v26_v18, %v25_v17  ;;  %v27_v20 = vld [vmem:[%s273_s1 + $0x60] sm:$0xff]  ;;  %v28_v21 = vld [vmem:[%s273_s1 + $0x68] sm:$0xff]  ;;  %v29_v23 = vld [vmem:[%s273_s1 + $0x70] sm:$0xff] }
   0x6   :  { %v185_v22 = vpack.c.bf16 %v28_v21, %v27_v20  ;;  %v30_v24 = vld [vmem:[%s273_s1 + $0x78] sm:$0xff]  ;;  %v14_v26 = vld [vmem:[%s274_s0] sm:$0xff] }
   0x7   :  { %v188_v25 = vpack.c.bf16 %v30_v24, %v29_v23  ;;  %v113_v27 = vld [vmem:[%s275_s2] ss:$0 sm:$0xff] }
   0x8   :  { %171 = vmatpush3.bf16.msra.mxu0 %v170_v7 }
   0x9   :  { %172 = vmatprep.subr.bf16.mxu0 %v193_v0 }
   0xc   :  { %174 = vmatpush3.bf16.msra.mxu0 %v173_v10 }
   0xd   :  { %175 = vmatprep.subr.bf16.mxu0 %v193_v0 }
  0x10   :  { %177 = vmatpush3.bf16.msra.mxu0 %v176_v13 }
  0x11   :  { %178 = vmatprep.subr.bf16.mxu0 %v193_v0 }
  0x14   :  { %180 = vmatpush3.bf16.msra.mxu0 %v179_v16 }
  0x15   :  { %181 = vmatprep.subr.bf16.mxu0 %v193_v0 }
  0x18   :  { %183 = vmatpush3.bf16.msra.mxu0 %v182_v19 }
  0x19   :  { %184 = vmatprep.subr.bf16.mxu0 %v193_v0 }
  0x1c   :  { %186 = vmatpush3.bf16.msra.mxu0 %v185_v22 }
  0x1d   :  { %187 = vmatprep.subr.bf16.mxu0 %v193_v0 }
  0x20   :  { %189 = vmatpush3.bf16.msra.mxu0 %v188_v25 }
  0x23   :  { %164 = vmatmul.mubr.f32.vlgmr.msra.gmra.mrb[0].mxu0 %v14_v26 }
  0xf6   :  { %v104_v28 = vpop.f32.mrb[0].mxu0 }
  0xf7   :  { %v105_v29 = vadd.f32 %v113_v27, %v104_v28  ;;  %v165_v30 = vpop.f32.mrb[1].mxu0 }
  0xf9   :  { %108 = vst [vmem:[%s276_s3] sm:$0xff] %v105_v29 }

// kernel: lstm_model_forward.96
= control target key start
LH: loop header
LB: loop body
LE: loop exit
PB: predicated region body
PF: predicated region fallthrough
CT: control target
= control target key end

     0   :  { %v1596_v0 = vlaneseq  ;;  %v1039_v1 = vmov 1966171168   ;;  %vm106_vm0 = vcmask 523264   ;;  %vm412_vm1 = vcmask 261120   ;;  %s1589_s0 = inlined_call_operand.vmem [shape: f32[2,64], index: 0, kind: input, shape index: {}]   ;;  %s1590_s2 = inlined_call_operand.vmem [shape: f32[2,96,64], index: 2, kind: input, shape index: {}]   ;;  %s1591_s4 = inlined_call_operand.vmem [shape: f32[2,96], index: 4, kind: input, shape index: {}]   ;;  %s1592_s1 = inlined_call_operand.vmem [shape: f32[2,32], index: 1, kind: input, shape index: {}]   ;;  %s1593_s3 = inlined_call_operand.vmem [shape: f32[2,96,32], index: 3, kind: input, shape index: {}]   ;;  %s1594_s5 = inlined_call_operand.vmem [shape: f32[2,96], index: 5, kind: input, shape index: {}]   ;;  %s1595_s6 = inlined_call_operand.vmem [shape: f32[2,32], index: 6, kind: output, shape index: {}]  }
   0x1   :  { %v35_v2 = vunpack.c.l.s4 %v1039_v1  ;;  %v938_v5 = vld.sshfl [vmem:[%s1589_s0] sm:$0x11 pattern:$0x75316420]  ;;  %v50_v9 = vld [vmem:[%s1590_s2 + $0x10] sm:$0xff]  ;;  %v51_v11 = vld [vmem:[%s1590_s2 + $0x18] sm:$0xff] }
   0x2   :  { %v1077_v3 = vshrl.u32 %v1596_v0, 7  ;;  %v48_v10 = vld [vmem:[%s1590_s2] sm:$0xff]  ;;  %v49_v12 = vld [vmem:[%s1590_s2 + $0x8] sm:$0xff]  ;;  %v55_v26 = vld [vmem:[%s1590_s2 + $0x38] sm:$0xff]  ;;  %v33_v28 = vcombine.high %v938_v5, %v938_v5  ;;  %vm894_vm2 = vcmask 130112   ;;  %vm901_vm3 = vcmask 195712  }
   0x3   :  { %v36_v4 = vunpack.c.0.s8 %v35_v2  ;;  %v53_v18 = vld [vmem:[%s1590_s2 + $0x28] sm:$0xff]  ;;  %v52_v19 = vld [vmem:[%s1590_s2 + $0x20] sm:$0xff]  ;;  %v54_v27 = vld [vmem:[%s1590_s2 + $0x30] sm:$0xff]  ;;  %vm908_vm4 = vcmask 261312   ;;  %vm929_vm5 = vcmask 1041409   ;;  %vm932_vm6 = vcmask 254976  }
   0x4   :  { %1599 = vst [vmem:[#allocation2_spill] sm:$0xff] %v1077_v3  ;;  %v1086_v7 = vsub.s32 0, %v1077_v3  ;;  %v57_v33 = vld [vmem:[%s1590_s2 + $0x48] sm:$0xff]  ;;  %v56_v34 = vld [vmem:[%s1590_s2 + $0x40] sm:$0xff]  ;;  %v59_v40 = vld [vmem:[%s1590_s2 + $0x58] sm:$0xff] }
   0x5   :  { %v1083_v6 = vsub.s32 %v36_v4, %v1077_v3  ;;  %v58_v41 = vld [vmem:[%s1590_s2 + $0x50] sm:$0xff]  ;;  %v61_v47 = vld [vmem:[%s1590_s2 + $0x68] sm:$0xff]  ;;  %v60_v48 = vld [vmem:[%s1590_s2 + $0x60] sm:$0xff] }
   0x6   :  { %v63_v53 = vld [vmem:[%s1590_s2 + $0x78] sm:$0xff]  ;;  %v62_v54 = vld [vmem:[%s1590_s2 + $0x70] sm:$0xff]  ;;  %v65_v59 = vld [vmem:[%s1590_s2 + $0x88] sm:$0xff] }
   0x7   :  { %v40_v8 = vrot.slane %v938_v5, %v1083_v6  ;;  %v47_v35 = vrot.slane %v33_v28, %v1083_v6  ;;  %v64_v60 = vld [vmem:[%s1590_s2 + $0x80] sm:$0xff]  ;;  %v67_v2 = vld [vmem:[%s1590_s2 + $0x98] sm:$0xff]  ;;  %v66_v4 = vld [vmem:[%s1590_s2 + $0x90] sm:$0xff] }
   0x9   :  { %v75_v13 = vrot.slane %v40_v8, %v1086_v7  ;;  %v79_v42 = vrot.slane %v47_v35, %v1086_v7 }
   0xb   :  { %v84_v14 = vmul.f32 %v75_v13, %v50_v9  ;;  %v82_v15 = vmul.f32 %v75_v13, %v48_v10  ;;  %v85_v16 = vmul.f32 %v75_v13, %v51_v11  ;;  %v83_v17 = vmul.f32 %v75_v13, %v49_v12  ;;  %v69_v11 = vld [vmem:[%s1590_s2 + $0xa8] sm:$0xff]  ;;  %v68_v12 = vld [vmem:[%s1590_s2 + $0xa0] sm:$0xff] }
   0xc   :  { %v87_v24 = vmul.f32 %v75_v13, %v53_v18  ;;  %v86_v25 = vmul.f32 %v75_v13, %v52_v19  ;;  %v89_v31 = vmul.f32 %v75_v13, %v55_v26  ;;  %v88_v32 = vmul.f32 %v75_v13, %v54_v27  ;;  %v70_v18 = vld [vmem:[%s1590_s2 + $0xb0] sm:$0xff]  ;;  %v1198_v27 = vld [vmem:[%s1592_s1] sm:$0x3] }
   0xd   :  { %v113_v20 = vsel %vm106_vm0, %v84_v14, 0.0  ;;  %v107_v21 = vsel %vm106_vm0, %v82_v15, 0.0  ;;  %v116_v22 = vsel %vm106_vm0, %v85_v16, 0.0  ;;  %v110_v23 = vsel %vm106_vm0, %v83_v17, 0.0  ;;  %v71_v17 = vld [vmem:[%s1590_s2 + $0xb8] sm:$0xff] }
   0xe   :  { %114 = vadd.xlane.f32.xlu1 %v113_v20  ;;  %108 = vadd.xlane.f32.xlu0 %v107_v21  ;;  %v122_v29 = vsel %vm106_vm0, %v87_v24, 0.0  ;;  %v119_v30 = vsel %vm106_vm0, %v86_v25, 0.0  ;;  %v128_v36 = vsel %vm106_vm0, %v89_v31, 0.0  ;;  %v125_v37 = vsel %vm106_vm0, %v88_v32, 0.0  ;;  %v1191_v25 = vld [vmem:[%s1591_s4] sm:$0x3] }
   0xf   :  { %v91_v38 = vmul.f32 %v75_v13, %v57_v33  ;;  %v90_v39 = vmul.f32 %v75_v13, %v56_v34  ;;  %v93_v45 = vmul.f32 %v75_v13, %v59_v40  ;;  %v92_v46 = vmul.f32 %v75_v13, %v58_v41  ;;  %v354_v33 = vld [vmem:[%s1593_s3] sm:$0xff] }
  0x10   :  { %v95_v51 = vmul.f32 %v79_v42, %v61_v47  ;;  %v94_v52 = vmul.f32 %v79_v42, %v60_v48  ;;  %v97_v57 = vmul.f32 %v79_v42, %v63_v53  ;;  %v96_v58 = vmul.f32 %v79_v42, %v62_v54 }
  0x11   :  { %v134_v43 = vsel %vm106_vm0, %v91_v38, 0.0  ;;  %v131_v44 = vsel %vm106_vm0, %v90_v39, 0.0  ;;  %v140_v49 = vsel %vm106_vm0, %v93_v45, 0.0  ;;  %v137_v50 = vsel %vm106_vm0, %v92_v46, 0.0  ;;  %v367_v39 = vld [vmem:[%s1593_s3 + $0x68] sm:$0xff] }
  0x12   :  { %117 = vadd.xlane.f32.xlu1 %v116_v22  ;;  %111 = vadd.xlane.f32.xlu0 %v110_v23  ;;  %v146_v55 = vsel %vm106_vm0, %v95_v51, 0.0  ;;  %v143_v56 = vsel %vm106_vm0, %v94_v52, 0.0  ;;  %v152_v61 = vsel %vm106_vm0, %v97_v57, 0.0  ;;  %v149_v62 = vsel %vm106_vm0, %v96_v58, 0.0 }
  0x13   :  { %v99_v63 = vmul.f32 %v79_v42, %v65_v59  ;;  %v98_v1 = vmul.f32 %v79_v42, %v64_v60  ;;  %v101_v9 = vmul.f32 %v79_v42, %v67_v2  ;;  %v100_v10 = vmul.f32 %v79_v42, %v66_v4 }
  0x14   :  { %v103_v15 = vmul.f32 %v79_v42, %v69_v11  ;;  %v102_v16 = vmul.f32 %v79_v42, %v68_v12  ;;  %v105_v21 = vmul.f32 %v79_v42, %v71_v17  ;;  %v104_v22 = vmul.f32 %v79_v42, %v70_v18  ;;  %v360_v11 = vld [vmem:[%s1593_s3 + $0x30] sm:$0xff]  ;;  %v485_v17 = vld [vmem:[%s1594_s5] sm:$0x3] }
  0x15   :  { %v158_v5 = vsel %vm106_vm0, %v99_v63, 0.0  ;;  %v155_v8 = vsel %vm106_vm0, %v98_v1, 0.0  ;;  %v164_v13 = vsel %vm106_vm0, %v101_v9, 0.0  ;;  %v161_v14 = vsel %vm106_vm0, %v100_v10, 0.0  ;;  %v372_v12 = vld [vmem:[%s1593_s3 + $0x90] sm:$0xff] }
  0x16   :  { %123 = vadd.xlane.f32.xlu1 %v122_v29  ;;  %120 = vadd.xlane.f32.xlu0 %v119_v30  ;;  %v170_v19 = vsel %vm106_vm0, %v103_v15, 0.0  ;;  %v167_v20 = vsel %vm106_vm0, %v102_v16, 0.0  ;;  %v176_v23 = vsel %vm106_vm0, %v105_v21, 0.0  ;;  %v173_v24 = vsel %vm106_vm0, %v104_v22, 0.0  ;;  %v361_v22 = vld [vmem:[%s1593_s3 + $0x38] sm:$0xff] }
  0x17   :  { %v184_v26 = vrot.slane %v1191_v25, %v1086_v7  ;;  %v338_v28 = vrot.slane %v1198_v27, %v1083_v6  ;;  %v1271_v9 = vsub.s32 1, %v1077_v3  ;;  %v1293_v18 = vrot.slane %v485_v17, %v1086_v7 }
  0x19   :  { %v346_v29 = vrot.slane %v338_v28, %v1083_v6  ;;  %v339_v30 = vcombine.high %v338_v28, %v338_v28  ;;  %v1275_v10 = vrot.slane %v1191_v25, %v1271_v9 }
  0x1a   :  { %129 = vadd.xlane.f32.xlu1 %v128_v36  ;;  %126 = vadd.xlane.f32.xlu0 %v125_v37  ;;  %v366_v36 = vld [vmem:[%s1593_s3 + $0x60] sm:$0xff] }
  0x1b   :  { %v1204_v31 = vrot.slane %v346_v29, %v1086_v7  ;;  %v353_v32 = vrot.slane %v339_v30, %v1083_v6  ;;  %v355_v6 = vld [vmem:[%s1593_s3 + $0x8] sm:$0xff]  ;;  %v362_v29 = vld [vmem:[%s1593_s3 + $0x40] sm:$0xff] }
  0x1c   :  { %v374_v30 = vld [vmem:[%s1593_s3 + $0xa0] sm:$0xff] }
  0x1d   :  { %v388_v34 = vmul.f32 %v1204_v31, %v354_v33  ;;  %v1212_v35 = vrot.slane %v353_v32, %v1086_v7  ;;  %v389_v41 = vmul.f32 %v1204_v31, %v355_v6  ;;  %v396_v33 = vmul.f32 %v1204_v31, %v362_v29 }
  0x1e   :  { %135 = vadd.xlane.f32.xlu1 %v134_v43  ;;  %132 = vadd.xlane.f32.xlu0 %v131_v44  ;;  %v368_v43 = vld [vmem:[%s1593_s3 + $0x70] sm:$0xff] }
  0x1f   :  { %v413_v37 = vsel %vm412_vm1, %v388_v34, 0.0  ;;  %v400_v38 = vmul.f32 %v1212_v35, %v366_v36  ;;  %v401_v42 = vmul.f32 %v1212_v35, %v367_v39  ;;  %v356_v44 = vld [vmem:[%s1593_s3 + $0x10] sm:$0xff]  ;;  %v416_v45 = vsel %vm412_vm1, %v389_v41, 0.0  ;;  %v375_v36 = vld [vmem:[%s1593_s3 + $0xa8] sm:$0xff] }
  0x20   :  { %v402_v47 = vmul.f32 %v1212_v35, %v368_v43  ;;  %v390_v48 = vmul.f32 %v1204_v31, %v356_v44  ;;  %v408_v34 = vmul.f32 %v1212_v35, %v374_v30  ;;  %v409_v6 = vmul.f32 %v1212_v35, %v375_v36 }
  0x21   :  { %v449_v40 = vsel %vm412_vm1, %v400_v38, 0.0  ;;  %v452_v46 = vsel %vm412_vm1, %v401_v42, 0.0 }
  0x22   :  { %141 = vadd.xlane.f32.xlu1 %v140_v49  ;;  %138 = vadd.xlane.f32.xlu0 %v137_v50  ;;  %v369_v49 = vld [vmem:[%s1593_s3 + $0x78] sm:$0xff]  ;;  %v455_v51 = vsel %vm412_vm1, %v402_v47, 0.0  ;;  %v419_v52 = vsel %vm412_vm1, %v390_v48, 0.0  ;;  %v473_v38 = vsel %vm412_vm1, %v408_v34, 0.0  ;;  %v476_v39 = vsel %vm412_vm1, %v409_v6, 0.0 }
  0x23   :  { %v357_v50 = vld [vmem:[%s1593_s3 + $0x18] sm:$0xff]  ;;  %v403_v53 = vmul.f32 %v1212_v35, %v369_v49 }
  0x24   :  { %v391_v54 = vmul.f32 %v1204_v31, %v357_v50 }
  0x25   :  { %v458_v57 = vsel %vm412_vm1, %v403_v53, 0.0  ;;  %v364_v53 = vld [vmem:[%s1593_s3 + $0x50] sm:$0xff] }
  0x26   :  { %147 = vadd.xlane.f32.xlu1 %v146_v55  ;;  %144 = vadd.xlane.f32.xlu0 %v143_v56  ;;  %v359_v55 = vld [vmem:[%s1593_s3 + $0x28] sm:$0xff]  ;;  %v358_v56 = vld [vmem:[%s1593_s3 + $0x20] sm:$0xff]  ;;  %v422_v58 = vsel %vm412_vm1, %v391_v54, 0.0  ;;  %v376_v54 = vld [vmem:[%s1593_s3 + $0xb0] sm:$0xff] }
  0x27   :  { %v393_v59 = vmul.f32 %v1204_v31, %v359_v55  ;;  %v392_v60 = vmul.f32 %v1204_v31, %v358_v56 }
  0x29   :  { %v428_v63 = vsel %vm412_vm1, %v393_v59, 0.0  ;;  %v425_v1 = vsel %vm412_vm1, %v392_v60, 0.0 }
  0x2a   :  { %153 = vadd.xlane.f32.xlu1 %v152_v61  ;;  %150 = vadd.xlane.f32.xlu0 %v149_v62  ;;  %v371_v61 = vld [vmem:[%s1593_s3 + $0x88] sm:$0xff]  ;;  %v370_v62 = vld [vmem:[%s1593_s3 + $0x80] sm:$0xff] }
  0x2b   :  { %v405_v2 = vmul.f32 %v1212_v35, %v371_v61  ;;  %v404_v4 = vmul.f32 %v1212_v35, %v370_v62 }
  0x2e   :  { %159 = vadd.xlane.f32.xlu1 %v158_v5  ;;  %156 = vadd.xlane.f32.xlu0 %v155_v8  ;;  %v464_v5 = vsel %vm412_vm1, %v405_v2, 0.0  ;;  %v461_v8 = vsel %vm412_vm1, %v404_v4, 0.0 }
  0x32   :  { %165 = vadd.xlane.f32.xlu1 %v164_v13  ;;  %162 = vadd.xlane.f32.xlu0 %v161_v14  ;;  %v394_v13 = vmul.f32 %v1204_v31, %v360_v11  ;;  %v406_v14 = vmul.f32 %v1212_v35, %v372_v12 }
  0x34   :  { %v431_v15 = vsel %vm412_vm1, %v394_v13, 0.0  ;;  %v467_v16 = vsel %vm412_vm1, %v406_v14, 0.0 }
  0x36   :  { %171 = vadd.xlane.f32.xlu1 %v170_v19  ;;  %168 = vadd.xlane.f32.xlu0 %v167_v20  ;;  %v1297_v19 = vrot.slane %v485_v17, %v1271_v9  ;;  %v373_v20 = vld [vmem:[%s1593_s3 + $0x98] sm:$0xff] }
  0x37   :  { %v407_v21 = vmul.f32 %v1212_v35, %v373_v20 }
  0x3a   :  { %177 = vadd.xlane.f32.xlu1 %v176_v23  ;;  %174 = vadd.xlane.f32.xlu0 %v173_v24  ;;  %v470_v23 = vsel %vm412_vm1, %v407_v21, 0.0  ;;  %v395_v24 = vmul.f32 %v1204_v31, %v361_v22  ;;  %v365_v21 = vld [vmem:[%s1593_s3 + $0x58] sm:$0xff] }
  0x3b   :  { %v377_v22 = vld [vmem:[%s1593_s3 + $0xb8] sm:$0xff] }
  0x3c   :  { %v434_v25 = vsel %vm412_vm1, %v395_v24, 0.0  ;;  %v411_v24 = vmul.f32 %v1212_v35, %v377_v22  ;;  %v811_v22 = vrot.slane %v1198_v27, %v1271_v9 }
  0x3e   :  { %v482_v29 = vsel %vm412_vm1, %v411_v24, 0.0 }
  0x4b   :  { %190 = vbcast.lane.b32.xlu1 %v184_v26, 264 }
  0x4f   :  { %194 = vbcast.lane.b32.xlu1 %v184_v26, 272 }
  0x50   :  { %186 = vbcast.lane.b32.xlu0 %v184_v26, 256 }
  0x53   :  { %198 = vbcast.lane.b32.xlu1 %v184_v26, 280 }
  0x54   :  { %202 = vbcast.lane.b32.xlu0 %v184_v26, 288 }
  0x57   :  { %206 = vbcast.lane.b32.xlu1 %v184_v26, 296 }
  0x58   :  { %210 = vbcast.lane.b32.xlu0 %v184_v26, 304 }
  0x5b   :  { %214 = vbcast.lane.b32.xlu1 %v184_v26, 312 }
  0x5c   :  { %218 = vbcast.lane.b32.xlu0 %v184_v26, 320 }
  0x5f   :  { %222 = vbcast.lane.b32.xlu1 %v184_v26, 328 }
  0x60   :  { %226 = vbcast.lane.b32.xlu0 %v184_v26, 336 }
  0x63   :  { %230 = vbcast.lane.b32.xlu1 %v184_v26, 344  ;;  %v363_v26 = vld [vmem:[%s1593_s3 + $0x48] sm:$0xff] }
  0x64   :  { %v397_v28 = vmul.f32 %v1204_v31, %v363_v26 }
  0x66   :  { %v440_v32 = vsel %vm412_vm1, %v397_v28, 0.0 }
  0x7f   :  { %414 = vadd.xlane.f32.xlu0 %v413_v37  ;;  %v437_v37 = vsel %vm412_vm1, %v396_v33, 0.0 }
  0x83   :  { %450 = vadd.xlane.f32.xlu0 %v449_v40 }
  0x87   :  { %417 = vadd.xlane.f32.xlu1 %v416_v45  ;;  %453 = vadd.xlane.f32.xlu0 %v452_v46 }
  0x8b   :  { %456 = vadd.xlane.f32.xlu1 %v455_v51  ;;  %420 = vadd.xlane.f32.xlu0 %v419_v52 }
  0x8f   :  { %459 = vadd.xlane.f32.xlu1 %v458_v57  ;;  %423 = vadd.xlane.f32.xlu0 %v422_v58  ;;  %v398_v57 = vmul.f32 %v1204_v31, %v364_v53  ;;  %v410_v58 = vmul.f32 %v1212_v35, %v376_v54 }
  0x91   :  { %v443_v59 = vsel %vm412_vm1, %v398_v57, 0.0  ;;  %v479_v60 = vsel %vm412_vm1, %v410_v58, 0.0  ;;  %v792_v58 = vrot.slane %v1198_v27, %v1086_v7 }
  0x93   :  { %429 = vadd.xlane.f32.xlu1 %v428_v63  ;;  %426 = vadd.xlane.f32.xlu0 %v425_v1 }
  0x97   :  { %465 = vadd.xlane.f32.xlu1 %v464_v5  ;;  %462 = vadd.xlane.f32.xlu0 %v461_v8 }
  0x9b   :  { %v1345_v40 = vpop.xlane.xlu0 %108  ;;  %v1347_v41 = vpop.xlane.xlu1 %114 }
  0x9f   :  { %v1349_v42 = vpop.xlane.xlu0 %111  ;;  %v1352_v43 = vpop.xlane.xlu1 %117 }
  0xa3   :  { %v1354_v44 = vpop.xlane.xlu0 %120  ;;  %v1357_v45 = vpop.xlane.xlu1 %123 }
  0xa7   :  { %v1359_v46 = vpop.xlane.xlu0 %126  ;;  %v1362_v47 = vpop.xlane.xlu1 %129 }
  0xa8   :  { %241 = vbcast.lane.b32.xlu1 %v1275_v10, 264 }
  0xab   :  { %v1364_v48 = vpop.xlane.xlu0 %132  ;;  %v1366_v49 = vpop.xlane.xlu1 %135 }
  0xac   :  { %1600 = vst [vmem:[#allocation3_spill] sm:$0xff] %v1364_v48  ;;  %1601 = vst [vmem:[#allocation4_spill] sm:$0xff] %v1366_v49 }
  0xad   :  { %237 = vbcast.lane.b32.xlu0 %v1275_v10, 256 }
  0xaf   :  { %v1368_v50 = vpop.xlane.xlu0 %138  ;;  %v1370_v51 = vpop.xlane.xlu1 %141 }
  0xb0   :  { %1602 = vst [vmem:[#allocation5_spill] sm:$0xff] %v1368_v50  ;;  %1603 = vst [vmem:[#allocation6_spill] sm:$0xff] %v1370_v51 }
  0xb3   :  { %v1372_v52 = vpop.xlane.xlu0 %144  ;;  %v1380_v55 = vpop.xlane.xlu1 %147 }
  0xb7   :  { %v1382_v56 = vpop.xlane.xlu0 %150  ;;  %v1388_v61 = vpop.xlane.xlu1 %153 }
  0xbb   :  { %v1390_v62 = vpop.xlane.xlu0 %156  ;;  %v1392_v63 = vpop.xlane.xlu1 %159 }
  0xbf   :  { %v1394_v1 = vpop.xlane.xlu0 %162  ;;  %v1396_v2 = vpop.xlane.xlu1 %165 }
  0xc0   :  { %1604 = vst [vmem:[#allocation7_spill] sm:$0xff] %v1394_v1  ;;  %1605 = vst [vmem:[#allocation8_spill] sm:$0xff] %v1396_v2 }
  0xc3   :  { %v1398_v4 = vpop.xlane.xlu0 %168  ;;  %v1400_v5 = vpop.xlane.xlu1 %171 }
  0xc4   :  { %1606 = vst [vmem:[#allocation9_spill] sm:$0xff] %v1398_v4  ;;  %1607 = vst [vmem:[#allocation10_spill] sm:$0xff] %v1400_v5 }
  0xc7   :  { %v1402_v8 = vpop.xlane.xlu0 %174  ;;  %v1406_v11 = vpop.xlane.xlu1 %177 }
  0xc8   :  { %1608 = vst [vmem:[#allocation11_spill] sm:$0xff] %v1402_v8  ;;  %1609 = vst [vmem:[#allocation12_spill] sm:$0xff] %v1406_v11 }
  0xcb   :  { %v1408_v12 = vpop.permute.xlu0 %186  ;;  %v1410_v13 = vpop.permute.xlu1 %190 }
  0xcc   :  { %432 = vadd.xlane.f32.xlu1 %v431_v15  ;;  %468 = vadd.xlane.f32.xlu0 %v467_v16  ;;  %v308_v48 = vadd.f32 %v1410_v13, %v1349_v42 }
  0xcf   :  { %v1412_v14 = vpop.permute.xlu0 %202  ;;  %v1414_v15 = vpop.permute.xlu1 %194 }
  0xd0   :  { %v309_v13 = vadd.f32 %v1414_v15, %v1347_v41 }
  0xd3   :  { %v1416_v16 = vpop.permute.xlu0 %210  ;;  %v1418_v17 = vpop.permute.xlu1 %198 }
  0xd7   :  { %v1420_v20 = vpop.permute.xlu0 %218 }
  0xd8   :  { %1610 = vst [vmem:[#allocation13_spill] sm:$0xff] %v1420_v20 }
  0xdb   :  { %v1432_v26 = vpop.permute.xlu0 %226 }
  0xdc   :  { %1611 = vst [vmem:[#allocation14_spill] sm:$0xff] %v1432_v26 }
  0xdd   :  { %496 = vbcast.lane.b32.xlu1 %v1293_v18, 264 }
  0xe1   :  { %543 = vbcast.lane.b32.xlu1 %v1297_v19, 256 }
  0xe2   :  { %492 = vbcast.lane.b32.xlu0 %v1293_v18, 256 }
  0xe5   :  { %547 = vbcast.lane.b32.xlu1 %v1297_v19, 264 }
  0xe6   :  { %245 = vbcast.lane.b32.xlu0 %v1275_v10, 272 }
 0x105   :  { %471 = vadd.xlane.f32.xlu0 %v470_v23  ;;  %v399_v23 = vmul.f32 %v1204_v31, %v365_v21  ;;  %v1040_v21 = vmov 0  }
 0x106   :  { %957 = vset.pattern.permute.xlu0 %v1040_v21  ;;  %958 = vset.pattern.permute.xlu1 %v1040_v21 }
 0x107   :  { %v446_v28 = vsel %vm412_vm1, %v399_v23, 0.0 }
 0x109   :  { %435 = vadd.xlane.f32.xlu1 %v434_v25  ;;  %v1430_v25 = vpop.permute.xlu1 %206 }
 0x10c   :  { %v1436_v30 = vpop.xlane.xlu0 %414 }
 0x110   :  { %v1440_v33 = vpop.xlane.xlu0 %450 }
 0x114   :  { %v1444_v31 = vpop.xlane.xlu0 %453 }
 0x11a   :  { %551 = vbcast.lane.b32.xlu1 %v1297_v19, 272 }
 0x11b   :  { %500 = vbcast.lane.b32.xlu0 %v1293_v18, 272 }
 0x11e   :  { %249 = vbcast.lane.b32.xlu1 %v1275_v10, 280 }
 0x11f   :  { %504 = vbcast.lane.b32.xlu0 %v1293_v18, 280 }
 0x122   :  { %555 = vbcast.lane.b32.xlu1 %v1297_v19, 280 }
 0x123   :  { %253 = vbcast.lane.b32.xlu0 %v1275_v10, 288 }
 0x126   :  { %257 = vbcast.lane.b32.xlu1 %v1275_v10, 296 }
 0x127   :  { %508 = vbcast.lane.b32.xlu0 %v1293_v18, 288 }
 0x12a   :  { %512 = vbcast.lane.b32.xlu1 %v1293_v18, 296 }
 0x12b   :  { %559 = vbcast.lane.b32.xlu0 %v1297_v19, 288 }
 0x12e   :  { %563 = vbcast.lane.b32.xlu1 %v1297_v19, 296 }
 0x12f   :  { %261 = vbcast.lane.b32.xlu0 %v1275_v10, 304 }
 0x14e   :  { %441 = vadd.xlane.f32.xlu0 %v440_v32  ;;  %v1438_v32 = vpop.permute.xlu1 %214 }
 0x152   :  { %438 = vadd.xlane.f32.xlu1 %v437_v37  ;;  %474 = vadd.xlane.f32.xlu0 %v473_v38  ;;  %v1442_v34 = vpop.permute.xlu1 %222  ;;  %v1448_v37 = vpop.xlane.xlu0 %420 }
 0x153   :  { %1612 = vst [vmem:[#allocation15_spill] sm:$0xff] %v1442_v34 }
 0x156   :  { %477 = vadd.xlane.f32.xlu0 %v476_v39  ;;  %v1446_v35 = vpop.permute.xlu1 %230  ;;  %v1454_v6 = vpop.xlane.xlu0 %423 }
 0x157   :  { %1613 = vst [vmem:[#allocation16_spill] sm:$0xff] %v1446_v35 }
 0x15a   :  { %v418_v36 = vpop.xlane.xlu1 %417  ;;  %v1461_v53 = vpop.xlane.xlu0 %426 }
 0x15e   :  { %v1452_v38 = vpop.xlane.xlu1 %456  ;;  %v1468_v57 = vpop.xlane.xlu0 %462 }
 0x162   :  { %v1459_v39 = vpop.xlane.xlu1 %459 }
 0x163   :  { %516 = vbcast.lane.b32.xlu1 %v1293_v18, 304 }
 0x166   :  { %v1466_v54 = vpop.xlane.xlu1 %429 }
 0x167   :  { %265 = vbcast.lane.b32.xlu1 %v1275_v10, 312 }
 0x16c   :  { %567 = vbcast.lane.b32.xlu0 %v1297_v19, 304 }
 0x18b   :  { %444 = vadd.xlane.f32.xlu1 %v443_v59  ;;  %480 = vadd.xlane.f32.xlu0 %v479_v60  ;;  %v1475_v59 = vpop.xlane.xlu1 %465  ;;  %v238_v60 = vpop.permute.xlu0 %237 }
 0x19c   :  { %571 = vbcast.lane.b32.xlu1 %v1297_v19, 312 }
 0x1a1   :  { %520 = vbcast.lane.b32.xlu0 %v1293_v18, 312 }
 0x1c0   :  { %447 = vadd.xlane.f32.xlu1 %v446_v28  ;;  %483 = vadd.xlane.f32.xlu0 %v482_v29 }
 0x1d1   :  { %528 = vbcast.lane.b32.xlu1 %v1293_v18, 328 }
 0x1d5   :  { %575 = vbcast.lane.b32.xlu1 %v1297_v19, 320 }
 0x1d6   :  { %524 = vbcast.lane.b32.xlu0 %v1293_v18, 320 }
 0x1d9   :  { %579 = vbcast.lane.b32.xlu1 %v1297_v19, 328 }
 0x1da   :  { %532 = vbcast.lane.b32.xlu0 %v1293_v18, 336 }
 0x1dd   :  { %583 = vbcast.lane.b32.xlu1 %v1297_v19, 336 }
 0x1de   :  { %269 = vbcast.lane.b32.xlu0 %v1275_v10, 320 }
 0x1e1   :  { %273 = vbcast.lane.b32.xlu1 %v1275_v10, 328 }
 0x1e2   :  { %536 = vbcast.lane.b32.xlu0 %v1293_v18, 344  ;;  %v1480_v18 = vpop.xlane.xlu0 %468 }
 0x1e5   :  { %587 = vbcast.lane.b32.xlu1 %v1297_v19, 344  ;;  %v242_v19 = vpop.permute.xlu1 %241 }
 0x1e6   :  { %277 = vbcast.lane.b32.xlu0 %v1275_v10, 336  ;;  %v493_v7 = vpop.permute.xlu0 %492 }
 0x1e7   :  { %v613_v49 = vadd.f32 %v493_v7, %v1436_v30 }
 0x1e9   :  { %281 = vbcast.lane.b32.xlu1 %v1275_v10, 344  ;;  %v1482_v23 = vpop.xlane.xlu1 %432 }
 0x1ea   :  { %794 = vbcast.lane.b32.xlu0 %v792_v58, 256  ;;  %v246_v24 = vpop.permute.xlu0 %245 }
 0x1ed   :  { %798 = vbcast.lane.b32.xlu1 %v792_v58, 264  ;;  %v497_v10 = vpop.permute.xlu1 %496 }
 0x1ee   :  { %813 = vbcast.lane.b32.xlu0 %v811_v22, 256  ;;  %v1484_v28 = vpop.xlane.xlu0 %471  ;;  %v614_v34 = vadd.f32 %v497_v10, %v418_v36 }
 0x1ef   :  { %1614 = vst [vmem:[#allocation17_spill] sm:$0xff] %v1484_v28  ;;  %v307_v28 = vadd.f32 %v1408_v12, %v1345_v40 }
 0x1f0   :  { %v638_v1 = vadd.f32 %v614_v34, %v308_v48 }
 0x1f1   :  { %817 = vbcast.lane.b32.xlu1 %v811_v22, 264  ;;  %v544_v29 = vpop.permute.xlu1 %543  ;;  %v637_v36 = vadd.f32 %v613_v49, %v307_v28  ;;  %v321_v49 = vadd.f32 %v246_v24, %v1382_v56 }
 0x1f2   :  { %802 = vbcast.lane.b32.xlu0 %v792_v58, 272  ;;  %v501_v27 = vpop.permute.xlu0 %500  ;;  %v625_v2 = vadd.f32 %v544_v29, %v1440_v33  ;;  %v940_v40 = vmul.f32 -1.442695, %v638_v1 }
 0x1f3   :  { %v615_v30 = vadd.f32 %v501_v27, %v1448_v37  ;;  %v939_v12 = vmul.f32 -1.442695, %v637_v36 }
 0x1f4   :  { %959 = vpow2.f32 %v940_v40 }
 0x1f5   :  { %821 = vbcast.lane.b32.xlu1 %v811_v22, 272  ;;  %v548_v9 = vpop.permute.xlu1 %547  ;;  %961 = vpow2.f32 %v939_v12  ;;  %v1618_v12 = vld [vmem:[#allocation7_spill] sm:$0xff] }
 0x1f6   :  { %806 = vbcast.lane.b32.xlu0 %v792_v58, 280  ;;  %v505_v0 = vpop.permute.xlu0 %504 }
 0x1f9   :  { %825 = vbcast.lane.b32.xlu1 %v811_v22, 280  ;;  %v1486_v21 = vpop.xlane.xlu1 %435 }
 0x1fa   :  { %v1488_v11 = vpop.permute.xlu0 %253 }
 0x1fd   :  { %v552_v3 = vpop.permute.xlu1 %551 }
 0x1fe   :  { %v509_v5 = vpop.permute.xlu0 %508 }
 0x1ff   :  { %v617_v37 = vadd.f32 %v509_v5, %v1461_v53 }
 0x201   :  { %v1490_v8 = vpop.permute.xlu1 %249 }
 0x202   :  { %v1492_v51 = vpop.permute.xlu0 %559  ;;  %v322_v28 = vadd.f32 %v1490_v8, %v1388_v61  ;;  %v314_v61 = vadd.f32 %v1438_v32, %v1362_v47 }
 0x205   :  { %v556_v35 = vpop.permute.xlu1 %555 }
 0x206   :  { %v1496_v22 = vpop.permute.xlu0 %261 }
 0x207   :  { %1615 = vst [vmem:[#allocation18_spill] sm:$0xff] %v1496_v22  ;;  %v626_v22 = vadd.f32 %v548_v9, %v1444_v31  ;;  %v639_v31 = vadd.f32 %v615_v30, %v309_v13 }
 0x209   :  { %v1494_v58 = vpop.permute.xlu1 %257 }
 0x20a   :  { %v1498_v4 = vpop.xlane.xlu0 %441  ;;  %v324_v30 = vadd.f32 %v1494_v58, %v1392_v63  ;;  %v1620_v63 = vld [vmem:[#allocation17_spill] sm:$0xff] }
 0x20b   :  { %1616 = vst [vmem:[#allocation19_spill] sm:$0xff] %v1498_v4  ;;  %v319_v4 = vadd.f32 %v238_v60, %v1372_v52  ;;  %v627_v52 = vadd.f32 %v552_v3, %v1452_v38  ;;  %v941_v3 = vmul.f32 -1.442695, %v639_v31 }
 0x20d   :  { %v513_v26 = vpop.permute.xlu1 %512  ;;  %v641_v42 = vadd.f32 %v625_v2, %v319_v4  ;;  %v310_v2 = vadd.f32 %v1418_v17, %v1352_v43  ;;  %v643_v1 = vadd.f32 %v627_v52, %v321_v49  ;;  %v313_v43 = vadd.f32 %v1416_v16, %v1359_v46 }
 0x20e   :  { %v1500_v50 = vpop.xlane.xlu0 %474  ;;  %v618_v41 = vadd.f32 %v513_v26, %v1466_v54  ;;  %v960_v54 = vpop.eup %959  ;;  %v629_v46 = vadd.f32 %v1492_v51, %v1468_v57  ;;  %v1619_v31 = vld [vmem:[#allocation18_spill] sm:$0xff] }
 0x20f   :  { %1617 = vst [vmem:[#allocation20_spill] sm:$0xff] %v1500_v50  ;;  %v320_v50 = vadd.f32 %v242_v19, %v1380_v55  ;;  %v943_v48 = vmul.f32 -1.442695, %v641_v42  ;;  %v616_v55 = vadd.f32 %v505_v0, %v1454_v6  ;;  %v312_v0 = vadd.f32 %v1430_v25, %v1357_v45  ;;  %v962_v24 = vpop.eup %961 }
 0x210   :  { %v628_v45 = vadd.f32 %v556_v35, %v1459_v39  ;;  %v670_v35 = vadd.f32 1.0, %v960_v54  ;;  %v323_v39 = vadd.f32 %v1488_v11, %v1390_v62  ;;  %v669_v8 = vadd.f32 1.0, %v962_v24  ;;  %v1625_v24 = vld [vmem:[#allocation4_spill] sm:$0xff] }
 0x211   :  { %v1503_v20 = vpop.permute.xlu1 %563  ;;  %v642_v33 = vadd.f32 %v626_v22, %v320_v50  ;;  %v311_v50 = vadd.f32 %v1412_v14, %v1354_v44  ;;  %963 = vpow2.f32 %v943_v48  ;;  %v640_v56 = vadd.f32 %v616_v55, %v310_v2 }
 0x212   :  { %v1516_v10 = vpop.xlane.xlu0 %477  ;;  %v694_v17 = vadd.f32 %v618_v41, %v312_v0  ;;  %v945_v44 = vmul.f32 -1.442695, %v643_v1  ;;  %v644_v22 = vadd.f32 %v628_v45, %v322_v28  ;;  %v630_v36 = vadd.f32 %v1503_v20, %v1475_v59  ;;  %v1624_v45 = vld [vmem:[#allocation13_spill] sm:$0xff]  ;;  %v1626_v28 = vld [vmem:[#allocation15_spill] sm:$0xff] }
 0x213   :  { %v944_v34 = vmul.f32 -1.442695, %v642_v33  ;;  %v693_v5 = vadd.f32 %v617_v37, %v311_v50  ;;  %v942_v14 = vmul.f32 -1.442695, %v640_v56  ;;  %v325_v52 = vadd.f32 %v1619_v31, %v1618_v12 }
 0x214   :  { %v948_v53 = vmul.f32 -1.442695, %v694_v17  ;;  %v946_v33 = vmul.f32 -1.442695, %v644_v22  ;;  %v698_v62 = vadd.f32 %v630_v36, %v324_v30  ;;  %v1628_v30 = vld [vmem:[#allocation14_spill] sm:$0xff] }
 0x215   :  { %v1514_v7 = vpop.xlane.xlu1 %438  ;;  %965 = vpow2.f32 %v944_v34  ;;  %v947_v38 = vmul.f32 -1.442695, %v693_v5 }
 0x216   :  { %v568_v19 = vpop.permute.xlu0 %567  ;;  %967 = vpow2.f32 %v941_v3  ;;  %v952_v49 = vmul.f32 -1.442695, %v698_v62 }
 0x217   :  { %969 = vpow2.f32 %v945_v44  ;;  %v631_v20 = vadd.f32 %v568_v19, %v1480_v18 }
 0x218   :  { %971 = vpow2.f32 %v942_v14  ;;  %v1622_v14 = vld [vmem:[#allocation19_spill] sm:$0xff] }
 0x219   :  { %v517_v60 = vpop.permute.xlu1 %516  ;;  %973 = vpow2.f32 %v947_v38  ;;  %v699_v18 = vadd.f32 %v631_v20, %v325_v52 }
 0x21a   :  { %v619_v4 = vadd.f32 %v517_v60, %v1482_v23  ;;  %v1532_v15 = vpop.xlane.xlu0 %480  ;;  %975 = vpow2.f32 %v948_v53  ;;  %v1621_v60 = vld [vmem:[#allocation8_spill] sm:$0xff]  ;;  %v1623_v53 = vld [vmem:[#allocation3_spill] sm:$0xff] }
 0x21b   :  { %v964_v29 = vpop.eup %963 }
 0x21c   :  { %v695_v26 = vadd.f32 %v619_v4, %v313_v43  ;;  %v673_v57 = vadd.f32 1.0, %v964_v29  ;;  %v953_v4 = vmul.f32 -1.442695, %v699_v18 }
 0x21d   :  { %v266_v6 = vpop.permute.xlu1 %265 }
 0x21e   :  { %v521_v25 = vpop.permute.xlu0 %520  ;;  %v949_v23 = vmul.f32 -1.442695, %v695_v26  ;;  %v326_v2 = vadd.f32 %v266_v6, %v1621_v60 }
 0x21f   :  { %v620_v27 = vadd.f32 %v521_v25, %v1486_v21  ;;  %v966_v9 = vpop.eup %965  ;;  %v697_v21 = vadd.f32 %v629_v46, %v323_v39  ;;  %v315_v25 = vadd.f32 %v1624_v45, %v1623_v53  ;;  %v316_v46 = vadd.f32 %v1626_v28, %v1625_v24  ;;  %v1634_v45 = vld [vmem:[#allocation11_spill] sm:$0xff] }
 0x220   :  { %977 = vpow2.f32 %v949_v23  ;;  %v968_v51 = vpop.eup %967  ;;  %v674_v42 = vadd.f32 1.0, %v966_v9 }
 0x221   :  { %v1541_v16 = vpop.xlane.xlu1 %444  ;;  %v696_v13 = vadd.f32 %v620_v27, %v314_v61  ;;  %979 = vrcp.f32 %v670_v35  ;;  %v671_v40 = vadd.f32 1.0, %v968_v51  ;;  %v970_v59 = vpop.eup %969  ;;  %v951_v47 = vmul.f32 -1.442695, %v697_v21 }
 0x222   :  { %981 = vrcp.f32 %v669_v8  ;;  %v972_v32 = vpop.eup %971  ;;  %v675_v37 = vadd.f32 1.0, %v970_v59 }
 0x223   :  { %983 = vrcp.f32 %v673_v57  ;;  %v950_v48 = vmul.f32 -1.442695, %v696_v13  ;;  %v974_v55 = vpop.eup %973  ;;  %v672_v50 = vadd.f32 1.0, %v972_v32  ;;  %v1627_v57 = vld [vmem:[#allocation5_spill] sm:$0xff] }
 0x224   :  { %985 = vrcp.f32 %v674_v42  ;;  %v976_v34 = vpop.eup %975  ;;  %v725_v1 = vadd.f32 1.0, %v974_v55  ;;  %v317_v21 = vadd.f32 %v1628_v30, %v1627_v57 }
 0x225   :  { %v572_v11 = vpop.permute.xlu1 %571  ;;  %987 = vpow2.f32 %v946_v33  ;;  %v726_v56 = vadd.f32 1.0, %v976_v34  ;;  %v1629_v33 = vld [vmem:[#allocation20_spill] sm:$0xff] }
 0x226   :  { %v632_v58 = vadd.f32 %v572_v11, %v1620_v63  ;;  %989 = vrcp.f32 %v671_v40 }
 0x227   :  { %991 = vpow2.f32 %v951_v47 }
 0x228   :  { %v700_v0 = vadd.f32 %v632_v58, %v326_v2  ;;  %993 = vpow2.f32 %v950_v48 }
 0x229   :  { %995 = vpow2.f32 %v952_v49 }
 0x22a   :  { %v978_v3 = vpop.eup %977  ;;  %997 = vrcp.f32 %v675_v37  ;;  %v954_v54 = vmul.f32 -1.442695, %v700_v0  ;;  %v1631_v0 = vld [vmem:[#allocation6_spill] sm:$0xff] }
 0x22b   :  { %v980_v17 = vpop.eup %979  ;;  %999 = vrcp.f32 %v672_v50  ;;  %v727_v44 = vadd.f32 1.0, %v978_v3 }
 0x22c   :  { %v982_v6 = vpop.eup %981  ;;  %1001 = vrcp.f32 %v725_v1 }
 0x22d   :  { %v984_v23 = vpop.eup %983  ;;  %1003 = vrcp.f32 %v726_v56  ;;  %v1632_v56 = vld [vmem:[#allocation16_spill] sm:$0xff] }
 0x22e   :  { %v986_v9 = vpop.eup %985  ;;  %1005 = vpow2.f32 %v953_v4  ;;  %v318_v4 = vadd.f32 %v1632_v56, %v1631_v0 }
 0x22f   :  { %v988_v22 = vpop.eup %987  ;;  %1007 = vrcp.f32 %v727_v44 }
 0x230   :  { %v990_v8 = vpop.eup %989  ;;  %1009 = vpow2.f32 %v954_v54  ;;  %v676_v59 = vadd.f32 1.0, %v988_v22 }
 0x231   :  { %v992_v51 = vpop.eup %991 }
 0x232   :  { %v994_v13 = vpop.eup %993  ;;  %v729_v12 = vadd.f32 1.0, %v992_v51 }
 0x233   :  { %v996_v20 = vpop.eup %995  ;;  %v728_v63 = vadd.f32 1.0, %v994_v13 }
 0x234   :  { %v998_v32 = vpop.eup %997  ;;  %v730_v48 = vadd.f32 1.0, %v996_v20 }
 0x235   :  { %v1000_v52 = vpop.eup %999 }
 0x236   :  { %v1002_v58 = vpop.eup %1001 }
 0x237   :  { %v1004_v37 = vpop.eup %1003 }
 0x238   :  { %v1006_v18 = vpop.eup %1005 }
 0x239   :  { %v1008_v1 = vpop.eup %1007  ;;  %v731_v54 = vadd.f32 1.0, %v1006_v18 }
 0x24d   :  { %v1557_v19 = vpop.xlane.xlu1 %447  ;;  %v1559_v41 = vpop.xlane.xlu0 %483 }
 0x251   :  { %v529_v5 = vpop.permute.xlu1 %528  ;;  %v525_v43 = vpop.permute.xlu0 %524 }
 0x252   :  { %v622_v26 = vadd.f32 %v529_v5, %v1622_v14  ;;  %v621_v38 = vadd.f32 %v525_v43, %v1514_v7  ;;  %v1010_v43 = vpop.eup %1009  ;;  %v773_v14 = vsub.f32 1.0, %v1002_v58 }
 0x254   :  { %v750_v29 = vmul.f32 %v980_v17, %v622_v26  ;;  %v749_v27 = vmul.f32 %v982_v6, %v621_v38  ;;  %v774_v26 = vsub.f32 1.0, %v1004_v37  ;;  %v1633_v6 = vld [vmem:[#allocation10_spill] sm:$0xff] }
 0x255   :  { %v576_v35 = vpop.permute.xlu1 %575  ;;  %v533_v39 = vpop.permute.xlu0 %532 }
 0x256   :  { %v758_v7 = vadd.f32 %v750_v29, %v316_v46  ;;  %v757_v36 = vadd.f32 %v749_v27, %v315_v25  ;;  %v623_v61 = vadd.f32 %v533_v39, %v1541_v16  ;;  %v633_v62 = vadd.f32 %v576_v35, %v1629_v33  ;;  %v1630_v16 = vld [vmem:[#allocation9_spill] sm:$0xff]  ;;  %v1635_v33 = vld [vmem:[#allocation12_spill] sm:$0xff] }
 0x257   :  { %v775_v39 = vsub.f32 1.0, %v1008_v1 }
 0x258   :  { %1011 = vtanh.f32 %v758_v7  ;;  %v751_v42 = vmul.f32 %v990_v8, %v623_v61  ;;  %v753_v55 = vmul.f32 %v984_v23, %v633_v62  ;;  %v732_v7 = vadd.f32 1.0, %v1010_v43 }
 0x259   :  { %1013 = vtanh.f32 %v757_v36  ;;  %v580_v11 = vpop.permute.xlu1 %579  ;;  %v270_v40 = vpop.permute.xlu0 %269 }
 0x25a   :  { %v759_v47 = vadd.f32 %v751_v42, %v317_v21  ;;  %v327_v31 = vadd.f32 %v270_v40, %v1630_v16  ;;  %v634_v60 = vadd.f32 %v580_v11, %v1516_v10 }
 0x25c   :  { %1015 = vtanh.f32 %v759_v47  ;;  %v761_v50 = vadd.f32 %v753_v55, %v327_v31  ;;  %v754_v38 = vmul.f32 %v986_v9, %v634_v60 }
 0x25d   :  { %v584_v49 = vpop.permute.xlu1 %583  ;;  %v537_v34 = vpop.permute.xlu0 %536  ;;  %1017 = vrcp.f32 %v676_v59 }
 0x25e   :  { %v624_v2 = vadd.f32 %v537_v34, %v1557_v19  ;;  %1019 = vrcp.f32 %v729_v12  ;;  %v635_v3 = vadd.f32 %v584_v49, %v1532_v15 }
 0x25f   :  { %1021 = vrcp.f32 %v728_v63 }
 0x260   :  { %v752_v5 = vmul.f32 %v1000_v52, %v624_v2  ;;  %1023 = vrcp.f32 %v730_v48  ;;  %v755_v23 = vmul.f32 %v998_v32, %v635_v3 }
 0x261   :  { %v274_v17 = vpop.permute.xlu1 %273  ;;  %v278_v44 = vpop.permute.xlu0 %277  ;;  %1025 = vtanh.f32 %v761_v50 }
 0x262   :  { %v1012_v10 = vpop.eup %1011  ;;  %v760_v19 = vadd.f32 %v752_v5, %v318_v4  ;;  %v328_v53 = vadd.f32 %v274_v17, %v1633_v6  ;;  %v329_v25 = vadd.f32 %v278_v44, %v1634_v45 }
 0x263   :  { %v1014_v15 = vpop.eup %1013  ;;  %v782_v24 = vmul.f32 %v1012_v10, %v774_v26 }
 0x264   :  { %1027 = vtanh.f32 %v760_v19  ;;  %v762_v28 = vadd.f32 %v754_v38, %v328_v53  ;;  %v781_v46 = vmul.f32 %v1014_v15, %v773_v14  ;;  %v763_v29 = vadd.f32 %v755_v23, %v329_v25 }
 0x265   :  { %v588_v27 = vpop.permute.xlu1 %587  ;;  %v795_v35 = vpop.permute.xlu0 %794  ;;  %v1636_v25 = vlaneseq }
 0x266   :  { %v1016_v22 = vpop.eup %1015  ;;  %1029 = vtanh.f32 %v762_v28  ;;  %v636_v9 = vadd.f32 %v588_v27, %v1559_v41  ;;  %v835_v36 = vmul.f32 %v1002_v58, %v795_v35  ;;  %v1637_v27 = vld [vmem:[#allocation2_spill] sm:$0xff] }
 0x267   :  { %1031 = vrcp.f32 %v731_v54  ;;  %v783_v61 = vmul.f32 %v1016_v22, %v775_v39  ;;  %v1018_v8 = vpop.eup %1017  ;;  %v884_v15 = vand.u32 127, %v1636_v25 }
 0x268   :  { %v843_v51 = vadd.f32 %v835_v36, %v781_v46  ;;  %v1020_v57 = vpop.eup %1019  ;;  %1033 = vtanh.f32 %v763_v29  ;;  %v756_v13 = vmul.f32 %v1018_v8, %v636_v9 }
 0x269   :  { %v282_v30 = vpop.permute.xlu1 %281  ;;  %v814_v21 = vpop.permute.xlu0 %813  ;;  %1035 = vrcp.f32 %v732_v7  ;;  %v777_v12 = vsub.f32 1.0, %v1020_v57  ;;  %v896_v28 = vadd.s32 4294967280, %v884_v15  ;;  %v903_v39 = vadd.s32 4294967272, %v884_v15 }
 0x26a   :  { %v1022_v42 = vpop.eup %1021  ;;  %v330_v62 = vadd.f32 %v282_v30, %v1635_v33  ;;  %860 = vperm.xlu0 %957, %v843_v51   ;;  %v839_v55 = vmul.f32 %v1020_v57, %v814_v21  ;;  %v887_v7 = vsub.s32 %v884_v15, %v1637_v27 }
 0x26b   :  { %v1024_v11 = vpop.eup %1023  ;;  %v776_v47 = vsub.f32 1.0, %v1022_v42  ;;  %v899_v22 = vsub.s32 %v896_v28, %v1637_v27  ;;  %v906_v57 = vsub.s32 %v903_v39, %v1637_v27 }
 0x26c   :  { %v764_v40 = vadd.f32 %v756_v13, %v330_v62  ;;  %v1026_v20 = vpop.eup %1025  ;;  %v778_v52 = vsub.f32 1.0, %v1024_v11 }
 0x26d   :  { %v799_v59 = vpop.permute.xlu1 %798  ;;  %v803_v41 = vpop.permute.xlu0 %802  ;;  %v785_v48 = vmul.f32 %v1026_v20, %v777_v12 }
 0x26e   :  { %v1028_v32 = vpop.eup %1027  ;;  %1037 = vtanh.f32 %v764_v40  ;;  %v836_v16 = vmul.f32 %v1004_v37, %v799_v59  ;;  %v837_v31 = vmul.f32 %v1008_v1, %v803_v41 }
 0x26f   :  { %v784_v63 = vmul.f32 %v1028_v32, %v776_v47  ;;  %v847_v5 = vadd.f32 %v839_v55, %v785_v48 }
 0x270   :  { %v1030_v58 = vpop.eup %1029  ;;  %v844_v49 = vadd.f32 %v836_v16, %v782_v24  ;;  %v845_v34 = vadd.f32 %v837_v31, %v783_v61  ;;  %v889_v24 = vadd.s32 4294967288, %v884_v15 }
 0x271   :  { %v1032_v60 = vpop.eup %1031  ;;  %v818_v2 = vpop.permute.xlu1 %817  ;;  %v786_v18 = vmul.f32 %v1030_v58, %v778_v52 }
 0x272   :  { %v807_v50 = vpop.permute.xlu0 %806  ;;  %v840_v3 = vmul.f32 %v1024_v11, %v818_v2  ;;  %863 = vperm.xlu1 %958, %v844_v49   ;;  %v1034_v56 = vpop.eup %1033  ;;  %v779_v1 = vsub.f32 1.0, %v1032_v60  ;;  %v892_v35 = vsub.s32 %v889_v24, %v1637_v27 }
 0x273   :  { %v838_v0 = vmul.f32 %v1022_v42, %v807_v50  ;;  %v1036_v4 = vpop.eup %1035 }
 0x274   :  { %v848_v43 = vadd.f32 %v840_v3, %v786_v18  ;;  %v787_v44 = vmul.f32 %v1034_v56, %v779_v1  ;;  %v780_v26 = vsub.f32 1.0, %v1036_v4 }
 0x275   :  { %v846_v37 = vadd.f32 %v838_v0, %v784_v63  ;;  %v822_v17 = vpop.permute.xlu1 %821 }
 0x276   :  { %v841_v14 = vmul.f32 %v1032_v60, %v822_v17  ;;  %875 = vperm.xlu0 %957, %v848_v43   ;;  %872 = vperm.xlu1 %958, %v847_v5  }
 0x278   :  { %v1038_v10 = vpop.eup %1037  ;;  %v849_v38 = vadd.f32 %v841_v14, %v787_v44 }
 0x279   :  { %v826_v19 = vpop.permute.xlu1 %825  ;;  %v788_v6 = vmul.f32 %v1038_v10, %v780_v26 }
 0x27a   :  { %v842_v53 = vmul.f32 %v1036_v4, %v826_v19  ;;  %878 = vperm.xlu0 %957, %v849_v38   ;;  %866 = vperm.xlu1 %958, %v845_v34  }
 0x27c   :  { %v850_v45 = vadd.f32 %v842_v53, %v788_v6 }
 0x27e   :  { %881 = vperm.xlu0 %957, %v850_v45   ;;  %869 = vperm.xlu1 %958, %v846_v37  }
 0x2e9   :  { %v861_v54 = vpop.permute.xlu0 %860 }
 0x2ea   :  { %v888_v42 = vrot.slane %v861_v54, %v887_v7 }
 0x2f1   :  { %v864_v23 = vpop.permute.xlu1 %863 }
 0x2f2   :  { %v893_v61 = vrot.slane %v864_v23, %v892_v35 }
 0x2f4   :  { %v895_v62 = vsel %vm894_vm2, %v893_v61, %v888_v42 }
 0x2f5   :  { %v873_v46 = vpop.permute.xlu1 %872  ;;  %v876_v29 = vpop.permute.xlu0 %875 }
 0x2f6   :  { %v913_v8 = vrot.slane %v873_v46, %v887_v7  ;;  %v917_v51 = vrot.slane %v876_v29, %v892_v35 }
 0x2f8   :  { %v918_v11 = vsel %vm894_vm2, %v917_v51, %v913_v8 }
 0x2f9   :  { %v867_v9 = vpop.permute.xlu1 %866  ;;  %v879_v36 = vpop.permute.xlu0 %878 }
 0x2fa   :  { %v900_v30 = vrot.slane %v867_v9, %v899_v22  ;;  %v922_v21 = vrot.slane %v879_v36, %v899_v22 }
 0x2fc   :  { %v902_v59 = vsel %vm901_vm3, %v900_v30, %v895_v62  ;;  %v923_v41 = vsel %vm901_vm3, %v922_v21, %v918_v11 }
 0x2fd   :  { %v870_v13 = vpop.permute.xlu1 %869  ;;  %v882_v33 = vpop.permute.xlu0 %881 }
 0x2fe   :  { %v907_v40 = vrot.slane %v870_v13, %v906_v57  ;;  %v927_v20 = vrot.slane %v882_v33, %v906_v57 }
 0x300   :  { %v909_v47 = vsel %vm908_vm4, %v907_v40, %v902_v59  ;;  %v928_v32 = vsel %vm908_vm4, %v927_v20, %v923_v41 }
 0x301   :  { %v930_v12 = vsel %vm929_vm5, %v928_v32, %v909_v47 }
 0x302   :  { %933 = vst.msk [vmem:[%s1595_s6] sm:$0x3] %vm932_vm6, %v930_v12 }

// kernel: lstm_model_forward.154
= control target key start
LH: loop header
LB: loop body
LE: loop exit
PB: predicated region body
PF: predicated region fallthrough
CT: control target
= control target key end

     0   :  { %s603_s15 = smov 0   ;;  %s665_s0 = inlined_call_operand.vmem [shape: f32[4,2,64], index: 0, kind: input, shape index: {}]   ;;  %s666_s1 = inlined_call_operand.vmem [shape: f32[64,128], index: 1, kind: input, shape index: {}]   ;;  %s667_s2 = inlined_call_operand.vmem [shape: f32[32,128], index: 2, kind: input, shape index: {}]   ;;  %s668_s3 = inlined_call_operand.vmem [shape: f32[1,128], index: 3, kind: input, shape index: {}]   ;;  %s669_s4 = inlined_call_operand.vmem [shape: f32[4,2,32], index: 4, kind: output, shape index: {}]  }
   0x1 LB: > { %s464_s16 = sadd.s32 4294967295, %s569_s15   ;;  %p468_p0 = scmp.ge.s32.totalorder %s569_s15, 1  ;;  %s569_s15 = sphi %s603_s15, %s14_s15  }
   0x2   : > { %p161_p1 = scmp.lt.s32.totalorder %s569_s15, 5 }
   0x4   : > { %p162_p2 = pnand %p468_p0, %p161_p1 }
   0x5   : > { %p185_p3 = scmp.lt.s32.totalorder (!%p162_p2), %s464_s16, 3  ;;  %p471_p4 = scmp.ne.s32.totalorder (!%p162_p2), %s464_s16, 0 }
   0x6   : > { %165 = sbr.rel (%p162_p2) target bundleno = 744 (0x2e8), region = 36 }
   0xd   : > { %s186_s17 = scalar_select %p185_p3, %s464_s16, 3 }
   0xe   : > { %196 = sbr.rel (%p471_p4) target bundleno = 21 (0x15), region = 40  ;;  %vm197_vm0 = vcmask (!%p471_p4), 254976   ;;  %v571_v0 = vmov (!%p471_p4), 0.0  }
   0xf   : > { %s469_s18 = sshll.u32 %s186_s17, 1  ;;  %198 = vst.msk [vmem:[#allocation2] sm:$0x3] (!%p471_p4), %vm197_vm0, %v571_v0  ;;  %199 = vst.msk [vmem:[#allocation3] sm:$0x3] (!%p471_p4), %vm197_vm0, %v571_v0 }
  0x10   : > { %s614_s21 = scalar_lea.vmem %s665_s0, %s469_s18  ;;  %s619_s24 = scalar_lea.vmem %s669_s4, %s469_s18 }
  0x15 PF: > { %v201_v1 = vld [vmem:[%s666_s1] sm:$0xff]  ;;  %v202_v2 = vld [vmem:[%s666_s1 + $0x8] sm:$0xff]  ;;  %v203_v3 = vld [vmem:[%s666_s1 + $0x10] sm:$0xff]  ;;  %v572_v4 = vmov 0.0|0.0   ;;  %vm573_vm1 = vmmov 0   ;;  %v574_v11 = vmov 0.0  }
  0x16   : > { %528 = vmatprep.subr.bf16.mxu1 %v572_v4  ;;  %v529_v5 = vpack.c.bf16 %v202_v2, %v201_v1  ;;  %v204_v6 = vld [vmem:[%s666_s1 + $0x18] sm:$0xff]  ;;  %522 = vmatprep.subr.bf16.mxu0 %v572_v4  ;;  %v210_v7 = vld [vmem:[%s667_s2] sm:$0xff]  ;;  %v211_v8 = vld [vmem:[%s667_s2 + $0x8] sm:$0xff]  ;;  %vm214_vm2 = vcmask 261120   ;;  %vm288_vm3 = vcmask 523264   ;;  %s575_s28 = smov 64  }
  0x17   : > { %v523_v9 = vpack.c.bf16 %v211_v8, %v210_v7  ;;  %v212_v10 = vld [vmem:[%s667_s2 + $0x10] sm:$0xff]  ;;  %500 = vmatprep.mubr.msk.f32.mxu0 %vm573_vm1, %v574_v11  ;;  %519 = vmatprep.mubr.msk.f32.mxu1 %vm573_vm1, %v574_v11  ;;  %v532_v12 = vpack.c.bf16 %v204_v6, %v203_v3  ;;  %v213_v13 = vld [vmem:[%s667_s2 + $0x18] sm:$0xff]  ;;  %v205_v14 = vld [vmem:[%s666_s1 + $0x20] sm:$0xff]  ;;  %s576_s29 = smov 32   ;;  %vm403_vm4 = vcmask 254976  }
  0x18   : > { %530 = vmatpush3.bf16.msra.mxu1 %v529_v5  ;;  %v206_v15 = vld [vmem:[%s666_s1 + $0x28] sm:$0xff]  ;;  %v526_v16 = vpack.c.bf16 %v213_v13, %v212_v10  ;;  %v207_v18 = vld [vmem:[%s666_s1 + $0x30] sm:$0xff]  ;;  %v208_v19 = vld [vmem:[%s666_s1 + $0x38] sm:$0xff] }
  0x19   : > { %531 = vmatprep.subr.bf16.mxu1 %v572_v4  ;;  %524 = vmatpush3.bf16.msra.mxu0 %v523_v9  ;;  %v535_v17 = vpack.c.bf16 %v206_v15, %v205_v14  ;;  %v209_v20 = vld [vmem:[#allocation2] sm:$0x3]  ;;  %v538_v21 = vpack.c.bf16 %v208_v19, %v207_v18  ;;  %v377_v31 = vld [vmem:[#allocation3] sm:$0x3] }
  0x1a   : > { %525 = vmatprep.subr.bf16.mxu0 %v572_v4  ;;  %v200_v22 = vld [vmem:[%s614_s21] sm:$0x3]  ;;  %s577_s21 = smov 96  }
  0x1b   : > { %v474_v26 = vld [vmem:[%s668_s3] ss:$0 sm:$0xff] }
  0x1c   : > { %533 = vmatpush3.bf16.msra.mxu1 %v532_v12 }
  0x1d   : > { %534 = vmatprep.subr.bf16.mxu1 %v572_v4  ;;  %527 = vmatpush3.bf16.msra.mxu0 %v526_v16 }
  0x20   : > { %536 = vmatpush3.bf16.msra.mxu1 %v535_v17  ;;  %501 = vmatmul.mubr.msk.f32.vlgmr.msra.gmra.mrb[0].mxu0 %vm214_vm2, %v209_v20 }
  0x21   : > { %537 = vmatprep.subr.bf16.mxu1 %v572_v4 }
  0x24   : > { %539 = vmatpush3.bf16.msra.mxu1 %v538_v21 }
  0x27   : > { %520 = vmatmul.mubr.msk.f32.vlgmr.msra.gmra.mrb[0].mxu1 %vm288_vm3, %v200_v22 }
  0xf3   : > { %v284_v23 = vpop.f32.mrb[0].mxu0 }
  0xf4   : > { %v502_v24 = vpop.f32.mrb[1].mxu0 }
  0xfa   : > { %v358_v25 = vpop.f32.mrb[0].mxu1 }
  0xfb   : > { %v359_v27 = vadd.f32 %v358_v25, %v284_v23  ;;  %v521_v28 = vpop.f32.mrb[1].mxu1 }
  0xfd   : > { %v369_v29 = vadd.f32 %v474_v26, %v359_v27 }
  0xff   : > { %555 = vtanh.f32 %v369_v29  ;;  %v475_v32 = vmul.f32 -1.442695, %v369_v29 }
 0x101   : > { %557 = vpow2.f32 %v475_v32 }
 0x109   : > { %v556_v30 = vpop.eup %555 }
 0x10a   : > { %384 = vrot.lane.b32.xlu0 %v556_v30, %s575_s28 }
 0x10b   : > { %v558_v33 = vpop.eup %557 }
 0x10c   : > { %v373_v34 = vadd.f32 1.0, %v558_v33 }
 0x10e   : > { %379 = vrot.lane.b32.xlu0 %v377_v31, %s576_s29  ;;  %559 = vrcp.f32 %v373_v34 }
 0x118   : > { %v560_v35 = vpop.eup %559 }
 0x17c   : > { %v385_v36 = vpop.permute.xlu0 %384 }
 0x17d   : > { %v387_v37 = vmul.f32 %v560_v35, %v385_v36 }
 0x17f   : > { %389 = vrot.lane.b32.xlu1 %v387_v37, %s576_s29 }
 0x180   : > { %v380_v38 = vpop.permute.xlu0 %379 }
 0x181   : > { %v382_v39 = vmul.f32 %v560_v35, %v380_v38 }
 0x1f1   : > { %v390_v40 = vpop.permute.xlu1 %389 }
 0x1f2   : > { %v392_v41 = vadd.f32 %v390_v40, %v382_v39 }
 0x1f4   : > { %561 = vtanh.f32 %v392_v41  ;;  %400 = vrot.lane.b32.xlu0 %v392_v41, %s577_s21 }
 0x1fe   : > { %v562_v42 = vpop.eup %561 }
 0x1ff   : > { %395 = vrot.lane.b32.xlu1 %v562_v42, %s575_s28 }
 0x266   : > { %v401_v43 = vpop.permute.xlu0 %400 }
 0x267   : > { %404 = vst.msk [vmem:[#allocation3] sm:$0x3] %vm403_vm4, %v401_v43 }
 0x271   : > { %v396_v44 = vpop.permute.xlu1 %395 }
 0x272   : > { %v398_v45 = vmul.f32 %v560_v35, %v396_v44 }
 0x274   : > { %406 = vrot.lane.b32.xlu1 %v398_v45, %s576_s29 }
 0x2e6   : > { %v407_v46 = vpop.permute.xlu1 %406 }
 0x2e7   : > { %409 = vst.msk [vmem:[#allocation2] sm:$0x3] %vm403_vm4, %v407_v46  ;;  %410 = vst.msk [vmem:[%s619_s24] sm:$0x3] %vm403_vm4, %v407_v46 }
 0x2e8 PF: > { %s14_s15 = sadd.s32 1, %s569_s15  }
 0x2e9   : > { %p11_p5 = scmp.ge.s32.totalorder %s14_s15, 6  }
 0x2eb   :  { %13 = sbr.rel (!%p11_p5) target bundleno = 1 (0x1), region = 70 }

// kernel: lstm_model_forward.155
= control target key start
LH: loop header
LB: loop body
LE: loop exit
PB: predicated region body
PF: predicated region fallthrough
CT: control target
= control target key end

     0   :  { %v194_v0 = vmov 0.0|0.0   ;;  %vm195_vm0 = vmmov 0   ;;  %v196_v4 = vmov 0.0   ;;  %s274_s1 = inlined_call_operand.vmem [shape: f32[128,128], index: 1, kind: input, shape index: {}]   ;;  %s275_s0 = inlined_call_operand.vmem [shape: f32[8,128], index: 0, kind: input, shape index: {}]   ;;  %s276_s2 = inlined_call_operand.vmem [shape: f32[1,128], index: 2, kind: input, shape index: {}]   ;;  %s277_s3 = inlined_call_operand.vmem [shape: f32[8,128], index: 3, kind: output, shape index: {}]  }
   0x1   :  { %167 = vmatprep.subr.bf16.mxu0 %v194_v0  ;;  %v15_v1 = vld [vmem:[%s274_s1] sm:$0xff]  ;;  %v16_v2 = vld [vmem:[%s274_s1 + $0x8] sm:$0xff]  ;;  %v17_v3 = vld [vmem:[%s274_s1 + $0x10] sm:$0xff]  ;;  %164 = vmatprep.mubr.msk.f32.mxu0 %vm195_vm0, %v196_v4 }
   0x2   :  { %v168_v5 = vpack.c.bf16 %v16_v2, %v15_v1  ;;  %v18_v6 = vld [vmem:[%s274_s1 + $0x18] sm:$0xff]  ;;  %v19_v8 = vld [vmem:[%s274_s1 + $0x20] sm:$0xff]  ;;  %v20_v9 = vld [vmem:[%s274_s1 + $0x28] sm:$0xff] }
   0x3   :  { %v171_v7 = vpack.c.bf16 %v18_v6, %v17_v3  ;;  %v174_v10 = vpack.c.bf16 %v20_v9, %v19_v8  ;;  %v21_v11 = vld [vmem:[%s274_s1 + $0x30] sm:$0xff]  ;;  %v22_v12 = vld [vmem:[%s274_s1 + $0x38] sm:$0xff]  ;;  %v23_v14 = vld [vmem:[%s274_s1 + $0x40] sm:$0xff] }
   0x4   :  { %169 = vmatpush3.bf16.msra.mxu0 %v168_v5  ;;  %v177_v13 = vpack.c.bf16 %v22_v12, %v21_v11  ;;  %v24_v15 = vld [vmem:[%s274_s1 + $0x48] sm:$0xff]  ;;  %v25_v17 = vld [vmem:[%s274_s1 + $0x50] sm:$0xff]  ;;  %v26_v18 = vld [vmem:[%s274_s1 + $0x58] sm:$0xff] }
   0x5   :  { %170 = vmatprep.subr.bf16.mxu0 %v194_v0  ;;  %v180_v16 = vpack.c.bf16 %v24_v15, %v23_v14  ;;  %v183_v19 = vpack.c.bf16 %v26_v18, %v25_v17  ;;  %v27_v20 = vld [vmem:[%s274_s1 + $0x60] sm:$0xff]  ;;  %v28_v21 = vld [vmem:[%s274_s1 + $0x68] sm:$0xff]  ;;  %v29_v23 = vld [vmem:[%s274_s1 + $0x70] sm:$0xff] }
   0x6   :  { %v186_v22 = vpack.c.bf16 %v28_v21, %v27_v20  ;;  %v30_v24 = vld [vmem:[%s274_s1 + $0x78] sm:$0xff]  ;;  %v14_v26 = vld [vmem:[%s275_s0] sm:$0xff] }
   0x7   :  { %v189_v25 = vpack.c.bf16 %v30_v24, %v29_v23  ;;  %v114_v27 = vld [vmem:[%s276_s2] ss:$0 sm:$0xff] }
   0x8   :  { %172 = vmatpush3.bf16.msra.mxu0 %v171_v7 }
   0x9   :  { %173 = vmatprep.subr.bf16.mxu0 %v194_v0 }
   0xc   :  { %175 = vmatpush3.bf16.msra.mxu0 %v174_v10 }
   0xd   :  { %176 = vmatprep.subr.bf16.mxu0 %v194_v0 }
  0x10   :  { %178 = vmatpush3.bf16.msra.mxu0 %v177_v13 }
  0x11   :  { %179 = vmatprep.subr.bf16.mxu0 %v194_v0 }
  0x14   :  { %181 = vmatpush3.bf16.msra.mxu0 %v180_v16 }
  0x15   :  { %182 = vmatprep.subr.bf16.mxu0 %v194_v0 }
  0x18   :  { %184 = vmatpush3.bf16.msra.mxu0 %v183_v19 }
  0x19   :  { %185 = vmatprep.subr.bf16.mxu0 %v194_v0 }
  0x1c   :  { %187 = vmatpush3.bf16.msra.mxu0 %v186_v22 }
  0x1d   :  { %188 = vmatprep.subr.bf16.mxu0 %v194_v0 }
  0x20   :  { %190 = vmatpush3.bf16.msra.mxu0 %v189_v25 }
  0x23   :  { %165 = vmatmul.mubr.f32.vlgmr.msra.gmra.mrb[0].mxu0 %v14_v26 }
  0xf6   :  { %v104_v28 = vpop.f32.mrb[0].mxu0 }
  0xf7   :  { %v105_v29 = vadd.f32 %v114_v27, %v104_v28  ;;  %v166_v30 = vpop.f32.mrb[1].mxu0 }
  0xf9   :  { %v108_v31 = vmax.f32 %v105_v29, 0.0 }
  0xfb   :  { %109 = vst [vmem:[%s277_s3] sm:$0xff] %v108_v31 }

// kernel: lstm_model_forward.152
= control target key start
LH: loop header
LB: loop body
LE: loop exit
PB: predicated region body
PF: predicated region fallthrough
CT: control target
= control target key end

     0   :  { %s625_s15 = smov 0   ;;  %s699_s0 = inlined_call_operand.vmem [shape: f32[4,2,96], index: 0, kind: input, shape index: {}]   ;;  %s700_s1 = inlined_call_operand.vmem [shape: f32[96,128], index: 1, kind: input, shape index: {}]   ;;  %s701_s2 = inlined_call_operand.vmem [shape: f32[32,128], index: 2, kind: input, shape index: {}]   ;;  %s702_s3 = inlined_call_operand.vmem [shape: f32[1,128], index: 3, kind: input, shape index: {}]   ;;  %s703_s4 = inlined_call_operand.vmem [shape: f32[4,2,32], index: 4, kind: output, shape index: {}]  }
   0x1 LB: > { %s468_s16 = sadd.s32 4294967295, %s591_s15   ;;  %p472_p0 = scmp.ge.s32.totalorder %s591_s15, 1  ;;  %s591_s15 = sphi %s625_s15, %s14_s15  }
   0x2   : > { %p161_p1 = scmp.lt.s32.totalorder %s591_s15, 5 }
   0x4   : > { %p162_p2 = pnand %p472_p0, %p161_p1 }
   0x5   : > { %p185_p3 = scmp.lt.s32.totalorder (!%p162_p2), %s468_s16, 3  ;;  %p475_p4 = scmp.ne.s32.totalorder (!%p162_p2), %s468_s16, 0 }
   0x6   : > { %165 = sbr.rel (%p162_p2) target bundleno = 752 (0x2f0), region = 36 }
   0xd   : > { %s186_s17 = scalar_select %p185_p3, %s468_s16, 3 }
   0xe   : > { %196 = sbr.rel (%p475_p4) target bundleno = 21 (0x15), region = 40  ;;  %vm197_vm0 = vcmask (!%p475_p4), 254976   ;;  %v593_v0 = vmov (!%p475_p4), 0.0  }
   0xf   : > { %s473_s18 = sshll.u32 %s186_s17, 1  ;;  %198 = vst.msk [vmem:[#allocation2] sm:$0x3] (!%p475_p4), %vm197_vm0, %v593_v0  ;;  %199 = vst.msk [vmem:[#allocation3] sm:$0x3] (!%p475_p4), %vm197_vm0, %v593_v0 }
  0x10   : > { %s636_s21 = scalar_lea.vmem %s699_s0, %s473_s18  ;;  %s641_s24 = scalar_lea.vmem %s703_s4, %s473_s18 }
  0x15 PF: > { %v201_v1 = vld [vmem:[%s700_s1] sm:$0xff]  ;;  %v202_v2 = vld [vmem:[%s700_s1 + $0x8] sm:$0xff]  ;;  %v203_v3 = vld [vmem:[%s700_s1 + $0x10] sm:$0xff]  ;;  %v594_v4 = vmov 0.0|0.0   ;;  %vm595_vm1 = vmmov 0   ;;  %v596_v8 = vmov 0.0  }
  0x16   : > { %544 = vmatprep.subr.bf16.mxu1 %v594_v4  ;;  %v545_v5 = vpack.c.bf16 %v202_v2, %v201_v1  ;;  %v204_v6 = vld [vmem:[%s700_s1 + $0x18] sm:$0xff]  ;;  %538 = vmatprep.subr.bf16.mxu0 %v594_v4  ;;  %v214_v7 = vld [vmem:[%s701_s2] sm:$0xff]  ;;  %v215_v11 = vld [vmem:[%s701_s2 + $0x8] sm:$0xff]  ;;  %vm218_vm2 = vcmask 261120   ;;  %vm292_vm3 = vcmask 785408   ;;  %s597_s10 = smov 64  }
  0x17   : > { %508 = vmatprep.mubr.msk.f32.mxu0 %vm595_vm1, %v596_v8  ;;  %535 = vmatprep.mubr.msk.f32.mxu1 %vm595_vm1, %v596_v8  ;;  %v548_v9 = vpack.c.bf16 %v204_v6, %v203_v3  ;;  %v205_v10 = vld [vmem:[%s700_s1 + $0x20] sm:$0xff]  ;;  %v206_v12 = vld [vmem:[%s700_s1 + $0x28] sm:$0xff]  ;;  %v539_v13 = vpack.c.bf16 %v215_v11, %v214_v7  ;;  %v216_v14 = vld [vmem:[%s701_s2 + $0x10] sm:$0xff]  ;;  %s598_s11 = smov 32   ;;  %vm407_vm4 = vcmask 254976  }
  0x18   : > { %546 = vmatpush3.bf16.msra.mxu1 %v545_v5  ;;  %v217_v15 = vld [vmem:[%s701_s2 + $0x18] sm:$0xff]  ;;  %v551_v17 = vpack.c.bf16 %v206_v12, %v205_v10  ;;  %v207_v18 = vld [vmem:[%s700_s1 + $0x30] sm:$0xff]  ;;  %v213_v20 = vld [vmem:[#allocation2] sm:$0x3] }
  0x19   : > { %547 = vmatprep.subr.bf16.mxu1 %v594_v4  ;;  %540 = vmatpush3.bf16.msra.mxu0 %v539_v13  ;;  %v542_v16 = vpack.c.bf16 %v217_v15, %v216_v14  ;;  %v208_v19 = vld [vmem:[%s700_s1 + $0x38] sm:$0xff]  ;;  %v209_v22 = vld [vmem:[%s700_s1 + $0x40] sm:$0xff]  ;;  %v210_v23 = vld [vmem:[%s700_s1 + $0x48] sm:$0xff] }
  0x1a   : > { %541 = vmatprep.subr.bf16.mxu0 %v594_v4  ;;  %v554_v21 = vpack.c.bf16 %v208_v19, %v207_v18  ;;  %v557_v24 = vpack.c.bf16 %v210_v23, %v209_v22  ;;  %v211_v25 = vld [vmem:[%s700_s1 + $0x50] sm:$0xff]  ;;  %v212_v26 = vld [vmem:[%s700_s1 + $0x58] sm:$0xff]  ;;  %v200_v28 = vld [vmem:[%s636_s21] sm:$0x3]  ;;  %s599_s21 = smov 96  }
  0x1b   : > { %v560_v27 = vpack.c.bf16 %v212_v26, %v211_v25  ;;  %v478_v32 = vld [vmem:[%s702_s3] ss:$0 sm:$0xff]  ;;  %v381_v37 = vld [vmem:[#allocation3] sm:$0x3] }
  0x1c   : > { %549 = vmatpush3.bf16.msra.mxu1 %v548_v9 }
  0x1d   : > { %550 = vmatprep.subr.bf16.mxu1 %v594_v4  ;;  %543 = vmatpush3.bf16.msra.mxu0 %v542_v16 }
  0x20   : > { %552 = vmatpush3.bf16.msra.mxu1 %v551_v17  ;;  %509 = vmatmul.mubr.msk.f32.vlgmr.msra.gmra.mrb[0].mxu0 %vm218_vm2, %v213_v20 }
  0x21   : > { %553 = vmatprep.subr.bf16.mxu1 %v594_v4 }
  0x24   : > { %555 = vmatpush3.bf16.msra.mxu1 %v554_v21 }
  0x25   : > { %556 = vmatprep.subr.bf16.mxu1 %v594_v4 }
  0x28   : > { %558 = vmatpush3.bf16.msra.mxu1 %v557_v24 }
  0x29   : > { %559 = vmatprep.subr.bf16.mxu1 %v594_v4 }
  0x2c   : > { %561 = vmatpush3.bf16.msra.mxu1 %v560_v27 }
  0x2f   : > { %536 = vmatmul.mubr.msk.f32.vlgmr.msra.gmra.mrb[0].mxu1 %vm292_vm3, %v200_v28 }
  0xf3   : > { %v288_v29 = vpop.f32.mrb[0].mxu0 }
  0xf4   : > { %v510_v30 = vpop.f32.mrb[1].mxu0 }
 0x102   : > { %v362_v31 = vpop.f32.mrb[0].mxu1 }
 0x103   : > { %v363_v33 = vadd.f32 %v362_v31, %v288_v29  ;;  %v537_v34 = vpop.f32.mrb[1].mxu1 }
 0x105   : > { %v373_v35 = vadd.f32 %v478_v32, %v363_v33 }
 0x107   : > { %577 = vtanh.f32 %v373_v35  ;;  %v479_v38 = vmul.f32 -1.442695, %v373_v35 }
 0x109   : > { %579 = vpow2.f32 %v479_v38 }
 0x111   : > { %v578_v36 = vpop.eup %577 }
 0x112   : > { %388 = vrot.lane.b32.xlu0 %v578_v36, %s597_s10 }
 0x113   : > { %v580_v39 = vpop.eup %579 }
 0x114   : > { %v377_v40 = vadd.f32 1.0, %v580_v39 }
 0x116   : > { %383 = vrot.lane.b32.xlu0 %v381_v37, %s598_s11  ;;  %581 = vrcp.f32 %v377_v40 }
 0x120   : > { %v582_v41 = vpop.eup %581 }
 0x184   : > { %v389_v42 = vpop.permute.xlu0 %388 }
 0x185   : > { %v391_v43 = vmul.f32 %v582_v41, %v389_v42 }
 0x187   : > { %393 = vrot.lane.b32.xlu1 %v391_v43, %s598_s11 }
 0x188   : > { %v384_v44 = vpop.permute.xlu0 %383 }
 0x189   : > { %v386_v45 = vmul.f32 %v582_v41, %v384_v44 }
 0x1f9   : > { %v394_v46 = vpop.permute.xlu1 %393 }
 0x1fa   : > { %v396_v47 = vadd.f32 %v394_v46, %v386_v45 }
 0x1fc   : > { %583 = vtanh.f32 %v396_v47  ;;  %404 = vrot.lane.b32.xlu0 %v396_v47, %s599_s21 }
 0x206   : > { %v584_v48 = vpop.eup %583 }
 0x207   : > { %399 = vrot.lane.b32.xlu1 %v584_v48, %s597_s10 }
 0x26e   : > { %v405_v49 = vpop.permute.xlu0 %404 }
 0x26f   : > { %408 = vst.msk [vmem:[#allocation3] sm:$0x3] %vm407_vm4, %v405_v49 }
 0x279   : > { %v400_v50 = vpop.permute.xlu1 %399 }
 0x27a   : > { %v402_v51 = vmul.f32 %v582_v41, %v400_v50 }
 0x27c   : > { %410 = vrot.lane.b32.xlu1 %v402_v51, %s598_s11 }
 0x2ee   : > { %v411_v52 = vpop.permute.xlu1 %410 }
 0x2ef   : > { %413 = vst.msk [vmem:[#allocation2] sm:$0x3] %vm407_vm4, %v411_v52  ;;  %414 = vst.msk [vmem:[%s641_s24] sm:$0x3] %vm407_vm4, %v411_v52 }
 0x2f0 PF: > { %s14_s15 = sadd.s32 1, %s591_s15  }
 0x2f1   : > { %p11_p5 = scmp.ge.s32.totalorder %s14_s15, 6  }
 0x2f3   :  { %13 = sbr.rel (!%p11_p5) target bundleno = 1 (0x1), region = 70 }

// kernel: lstm_model_forward.157
= control target key start
LH: loop header
LB: loop body
LE: loop exit
PB: predicated region body
PF: predicated region fallthrough
CT: control target
= control target key end

     0   :  { %vm10_vm0 = vcmask 48128   ;;  %s96_s0 = inlined_call_operand.vmem [shape: f32[8,6], index: 0, kind: input, shape index: {}]   ;;  %s97_s1 = inlined_call_operand.hbm [shape: f32[8,6], index: 1, kind: output, shape index: {}]  }
   0x1   :  { %v9_v0 = vld [vmem:[%s96_s0] sm:$0xff] }
   0x2   :  { %6 = vsyncpa [#allocation3], 0  ;;  %v11_v1 = vsel %vm10_vm0, %v9_v0, -inf  ;;  %s67_s8 = smov [#allocation2]  }
   0x3   :  { %12 = vmax.xlane.f32.xlu0 %v11_v1  ;;  %s30_s9 = sshll.u32 %s67_s8, 4  ;;  %s31_s9 = int_to_ptr.vmem [resolvable:$true] %s30_s9 }
   0x4   :  { %s43_s0 = scalar_lea.vmem %s31_s9, 128  ;;  %p48_p1 = scmp.lt.s32.totalorder %s31_s9, %s31_s9 }
   0x5   :  { %p44_p0 = scmp.ne.s32.totalorder %s31_s9, %s43_s0  ;;  %p49_p2 = scmp.lt.s32.totalorder %s43_s0, %s43_s0 }
   0x7   :  { %p50_p3 = por %p49_p2, %p48_p1 }
   0x9   :  { %p51_p4 = pnand %p50_p3, %p44_p0 }
  0x90   :  { %v13_v2 = vpop.xlane.xlu0 %12 }
  0x91   :  { %v14_v3 = vsub.f32 %v9_v0, %v13_v2 }
  0x93   :  { %v15_v4 = vmul.f32 1.442695, %v14_v3 }
  0x95   :  { %39 = vpow2.f32 %v15_v4 }
  0x9f   :  { %v40_v5 = vpop.eup %39 }
  0xa0   :  { %v17_v6 = vsel %vm10_vm0, %v40_v5, 0.0 }
  0xa1   :  { %18 = vadd.xlane.f32.xlu0 %v17_v6 }
 0x12e   :  { %v19_v7 = vpop.xlane.xlu0 %18 }
 0x12f   :  { %41 = vlog2.f32 %v19_v7 }
 0x139   :  { %v42_v8 = vpop.eup %41 }
 0x13a   :  { %v21_v9 = vmul.f32 0.6931472, %v42_v8 }
 0x13c   :  { %v22_v10 = vsub.f32 %v14_v3, %v21_v9 }
 0x13e   :  { %23 = vst.msk [vmem:[#allocation2] sm:$0xff] %vm10_vm0, %v22_v10 }
 0x13f   :  { %54 = shalt.err (!%p51_p4)
}
 0x140   :  { %s55_s12 = scalar_lea.hbm %s97_s1, 128 }
 0x141   :  { %p56_p5 = scmp.ne.s32.totalorder %s97_s1, %s55_s12  ;;  %p59_p6 = scmp.lt.u32.totalorder %s55_s12, %s97_s1 }
 0x143   :  { %p61_p7 = pnand %p59_p6, %p56_p5 }
 0x145   :  { %64 = shalt.err (!%p61_p7)
}
 0x146   :  { %33 = dma.vmem_to_hbm [thread:$0]  %s31_s9, 128, %s97_s1, [#allocation3]  }
 0x147   :  { %65 = dma.done.wait [#allocation3], 128  }
 0x148   :  { %66 = vsyncadd [#allocation3], 4294967168 }
 0x149   :  { %37 = vsyncpa [#allocation3], 1 }

</bundles_post_ra>
